<compile_context>
chip_gen: v7x
topology: tpu7x:2x2x1
jax: 0.10.0
libtpu: 0.0.40
codegen_flags: <defaults>
</compile_context>

<pallas_src>
import functools

import jax
import jax.numpy as jnp
from jax.experimental import pallas as pl
from jax.experimental.pallas import tpu as pltpu

# ---- small synthetic CLIP-text config (shapes implied by the module) ----
VOCAB = 128
MAX_LEN = 8            # S  (stands in for max_length=77)
HIDDEN = 32            # D
HEADS = 2
HEAD_DIM = HIDDEN // HEADS
INTERMEDIATE = 128     # 4 * D
NUM_LAYERS = 2
EPS = 1e-5
SPECIAL_TOKENS = {"start": 2, "end": 3, "pad": 3}   # synthetic small-vocab ids


def _layer_norm(x, g, b):
    mu = jnp.mean(x, axis=-1, keepdims=True)
    xc = x - mu
    var = jnp.mean(xc * xc, axis=-1, keepdims=True)
    return xc * jax.lax.rsqrt(var + EPS) * g + b


# ---------------------------------------------------------------------------
# Fused Pallas kernel: all encoder layers + final LN + EOS gather + projection.
#   grid = (B // BLOCK_B, NUM_LAYERS); batch blocks "parallel", layers "arbitrary".
#   Activation (flattened to (BLOCK_B*S, D)) lives in VMEM scratch across layers.
# ---------------------------------------------------------------------------
def fused_clip_kernel(eos_ref,                 # SMEM [B] int32 (scalar prefetch)
                      x_ref,                   # (Bt, S, D)      f32 input embeddings
                      wqkv_ref,                # (1, 3H, D, HD)  bf16
                      bqkv_ref,                # (1, 3H, HD)     f32
                      wo_ref,                  # (1, H, HD, D)   bf16
                      w1_ref,                  # (1, D, I)       bf16
                      b1_ref,                  # (1, 1, I)       f32
                      w2_ref,                  # (1, I, D)       bf16
                      vecs_ref,                # (1, 8, D) f32 [ln1_g,ln1_b,ln2_g,ln2_b,bo,b2,0,0]
                      fin_ref,                 # (2, D) f32 final-LN [gain; bias]
                      tp_ref,                  # (D, D) bf16 text projection
                      cmask_ref,               # (S, S) f32 causal additive bias
                      z_ref,                   # (Bt, S, D) f32 output
                      pooled_ref,              # (Bt, 1, D) f32 output
                      x_scr):                  # VMEM (Bt*S, D) f32 resident activation
    b = pl.program_id(0)
    l = pl.program_id(1)
    n_layers = pl.num_programs(1)
    bf16 = jnp.bfloat16

    Bt, S, D = x_ref.shape
    N = Bt * S
    H = wo_ref.shape[1]
    HD = wo_ref.shape[2]

    @pl.when(l == 0)
    def _init():
        x_scr[...] = x_ref[...].reshape(N, D)

    x = x_scr[...]                                    # (N, D) f32

    vecs = vecs_ref[0]                                # (8, D)
    ln1_g, ln1_b = vecs[0:1], vecs[1:2]
    ln2_g, ln2_b = vecs[2:3], vecs[3:4]
    attn_bias, mlp_bias = vecs[4:5], vecs[5:6]

    # --- self-attention sub-block (pre-LN, causal) ---------------------------
    h1 = _layer_norm(x, ln1_g, ln1_b).astype(bf16)    # (N, D)
    wqkv = wqkv_ref[0]                                # (3H, D, HD) bf16
    bqkv = bqkv_ref[0][:, None, :]                    # (3H, 1, HD) f32
    wo = wo_ref[0]                                    # (H, HD, D)  bf16
    cbias = cmask_ref[...]                            # (S, S) f32 (precomputed)
    scale = 1.0 / (HD ** 0.5)

    attn_rows = []
    for i in range(Bt):                               # static loop; attention is per-sequence
        h1_i = h1[i * S:(i + 1) * S]                  # (S, D) static sublane slice
        h1_b = jnp.broadcast_to(h1_i, (3 * H, S, D))  # one broadcast, reused for q/k/v
        # one batched MXU einsum produces q, k and v for all heads (no lane slicing)
        qkv = jnp.einsum('zsd,zde->zse', h1_b, wqkv,
                         preferred_element_type=jnp.float32) + bqkv       # (3H, S, HD)
        q, k, v = qkv[0:H], qkv[H:2 * H], qkv[2 * H:3 * H]                # leading-dim slices

        s = jnp.einsum('hqe,hke->hqk', q.astype(bf16), k.astype(bf16),
                       preferred_element_type=jnp.float32) * scale + cbias
        s = s - jnp.max(s, axis=-1, keepdims=True)
        p = jnp.exp(s)
        p = p * pl.reciprocal(jnp.sum(p, axis=-1, keepdims=True), approx=True)
        ctx = jnp.einsum('hqk,hke->hqe', p.astype(bf16), v.astype(bf16),
                         preferred_element_type=jnp.float32)              # (H, S, HD)

        # output projection: one batched einsum over heads, then fold heads by summing
        o = jnp.einsum('hse,hed->hsd', ctx.astype(bf16), wo,
                       preferred_element_type=jnp.float32)                # (H, S, D)
        attn_rows.append(jnp.sum(o, axis=0))                              # (S, D)

    attn = jnp.concatenate(attn_rows, axis=0)                             # (N, D)
    x = x + attn + attn_bias

    # --- MLP sub-block (quick-GELU), on the flattened (N, D) activation -----
    h2 = _layer_norm(x, ln2_g, ln2_b).astype(bf16)
    m = jnp.dot(h2, w1_ref[0], preferred_element_type=jnp.float32) + b1_ref[0]   # (N, I)
    m = m * jax.nn.sigmoid(1.702 * m)                                            # quick gelu
    m = jnp.dot(m.astype(bf16), w2_ref[0], preferred_element_type=jnp.float32) + mlp_bias
    x = x + m
    x_scr[...] = x

    # --- last layer: final LN + EOS-row gather + text projection ------------
    @pl.when(l == n_layers - 1)
    def _finalize():
        fg, fb = fin_ref[0:1], fin_ref[1:2]
        z = _layer_norm(x, fg, fb)                     # (N, D)
        z_ref[...] = z.reshape(Bt, S, D)
        tp = tp_ref[...]
        for i in range(Bt):                            # static loop over the batch block
            eos = eos_ref[b * Bt + i]                  # scalar int32 from SMEM
            row = x_scr[pl.ds(i * S + eos, 1), :]      # (1, D) pre-LN row (not the output buf)
            row_z = _layer_norm(row, fg, fb)
            proj = jnp.dot(row_z.astype(bf16), tp,
                           preferred_element_type=jnp.float32)            # (1, D)
            pooled_ref[pl.ds(i, 1), :, :] = proj[:, None, :]


# ---------------------------------------------------------------------------
# Wrapper: single pallas_call over the whole encoder.
# ---------------------------------------------------------------------------
def run_clip_encoder(x, sp, fin, text_proj, eos_idx, *, block_b=None):
    B, S, D = x.shape
    L, _, I = sp["w1"].shape
    H, HD = HEADS, HEAD_DIM

    if block_b is None:
        # batch >= 2 blocks on the parallel axis when possible (feeds both TCs on v7x)
        block_b = max(1, B // 2)
    assert B % block_b == 0
    n_bblocks = B // block_b

    # grid-invariant causal additive bias, built once on the host
    row = jax.lax.broadcasted_iota(jnp.int32, (S, S), 0)
    col = jax.lax.broadcasted_iota(jnp.int32, (S, S), 1)
    causal = jnp.where(col > row, jnp.float32(-1e9), jnp.float32(0.0))

    bmap3 = lambda b, l, e: (b, 0, 0)
    wmap3 = lambda b, l, e: (l, 0, 0)
    wmap4 = lambda b, l, e: (l, 0, 0, 0)
    cmap2 = lambda b, l, e: (0, 0)

    in_specs = [
        pl.BlockSpec((block_b, S, D), bmap3),          # x embeddings (fetched once per b block)
        pl.BlockSpec((1, 3 * H, D, HD), wmap4),        # wqkv (bf16, head-split)
        pl.BlockSpec((1, 3 * H, HD), wmap3),           # bqkv (f32, head-split)
        pl.BlockSpec((1, H, HD, D), wmap4),            # wo per head (bf16)
        pl.BlockSpec((1, D, I), wmap3),                # w1 (bf16)
        pl.BlockSpec((1, 1, I), wmap3),                # b1
        pl.BlockSpec((1, I, D), wmap3),                # w2 (bf16)
        pl.BlockSpec((1, 8, D), wmap3),                # packed per-layer vector slab
        pl.BlockSpec((2, D), cmap2),                   # final LN gain/bias (fetched once)
        pl.BlockSpec((D, D), cmap2),                   # text projection (bf16, fetched once)
        pl.BlockSpec((S, S), cmap2),                   # causal bias (fetched once)
    ]
    out_specs = [
        pl.BlockSpec((block_b, S, D), bmap3),          # z
        pl.BlockSpec((block_b, 1, D), bmap3),          # pooled (kept 3-D for clean tiling)
    ]
    grid_spec = pltpu.PrefetchScalarGridSpec(
        num_scalar_prefetch=1,
        grid=(n_bblocks, L),
        in_specs=in_specs,
        out_specs=out_specs,
        scratch_shapes=[pltpu.VMEM((block_b * S, D), jnp.float32)],
    )
    z, pooled = pl.pallas_call(
        fused_clip_kernel,
        out_shape=(jax.ShapeDtypeStruct((B, S, D), jnp.float32),
                   jax.ShapeDtypeStruct((B, 1, D), jnp.float32)),
        grid_spec=grid_spec,
        compiler_params=pltpu.CompilerParams(
            dimension_semantics=("parallel", "arbitrary"),
            vmem_limit_bytes=64 * 1024 * 1024),
    )(eos_idx, x, sp["wqkv"], sp["bqkv"], sp["wo"], sp["w1"], sp["b1"],
      sp["w2"], sp["vecs"], fin, text_proj, causal)
    return z, pooled[:, 0, :]


# ---------------------------------------------------------------------------
# Parameter init (deterministic, synthetic) + stacking/packing for the kernel
# ---------------------------------------------------------------------------
def _pack_layer_params(layers):
    bf16, f32 = jnp.bfloat16, jnp.float32
    H, HD = HEADS, HEAD_DIM

    def split_cols(w):                                  # (D, D) -> (H, D, HD)
        return jnp.transpose(w.reshape(HIDDEN, H, HD), (1, 0, 2))

    wqkv = jnp.stack([jnp.concatenate([split_cols(lp["wq"]), split_cols(lp["wk"]),
                                       split_cols(lp["wv"])], axis=0)
                      for lp in layers]).astype(bf16)                         # (L, 3H, D, HD)
    bqkv = jnp.stack([jnp.concatenate([lp["bq"].reshape(H, HD), lp["bk"].reshape(H, HD),
                                       lp["bv"].reshape(H, HD)], axis=0)
                      for lp in layers]).astype(f32)                          # (L, 3H, HD)
    wo = jnp.stack([lp["wo"].reshape(H, HD, HIDDEN)
                    for lp in layers]).astype(bf16)                           # (L, H, HD, D)
    vecs = jnp.stack([jnp.concatenate([lp["ln1_g"], lp["ln1_b"], lp["ln2_g"], lp["ln2_b"],
                                       lp["bo"], lp["b2"],
                                       jnp.zeros((2, HIDDEN), f32)], axis=0)
                      for lp in layers]).astype(f32)                          # (L, 8, D)
    w1 = jnp.stack([lp["w1"] for lp in layers]).astype(bf16)                  # (L, D, I)
    b1 = jnp.stack([lp["b1"] for lp in layers]).astype(f32)                   # (L, 1, I)
    w2 = jnp.stack([lp["w2"] for lp in layers]).astype(bf16)                  # (L, I, D)
    return dict(wqkv=wqkv, bqkv=bqkv, wo=wo, w1=w1, b1=b1, w2=w2, vecs=vecs)


def init_params(key):
    ks = iter(jax.random.split(key, 64))
    layers = []
    for _ in range(NUM_LAYERS):
        layers.append({
            "ln1_g": 1.0 + 0.1 * jax.random.normal(next(ks), (1, HIDDEN), jnp.float32),
            "ln1_b": 0.1 * jax.random.normal(next(ks), (1, HIDDEN), jnp.float32),
            "wq": 0.02 * jax.random.normal(next(ks), (HIDDEN, HIDDEN), jnp.float32),
            "bq": 0.01 * jax.random.normal(next(ks), (1, HIDDEN), jnp.float32),
            "wk": 0.02 * jax.random.normal(next(ks), (HIDDEN, HIDDEN), jnp.float32),
            "bk": 0.01 * jax.random.normal(next(ks), (1, HIDDEN), jnp.float32),
            "wv": 0.02 * jax.random.normal(next(ks), (HIDDEN, HIDDEN), jnp.float32),
            "bv": 0.01 * jax.random.normal(next(ks), (1, HIDDEN), jnp.float32),
            "wo": 0.02 * jax.random.normal(next(ks), (HIDDEN, HIDDEN), jnp.float32),
            "bo": 0.01 * jax.random.normal(next(ks), (1, HIDDEN), jnp.float32),
            "ln2_g": 1.0 + 0.1 * jax.random.normal(next(ks), (1, HIDDEN), jnp.float32),
            "ln2_b": 0.1 * jax.random.normal(next(ks), (1, HIDDEN), jnp.float32),
            "w1": 0.02 * jax.random.normal(next(ks), (HIDDEN, INTERMEDIATE), jnp.float32),
            "b1": 0.01 * jax.random.normal(next(ks), (1, INTERMEDIATE), jnp.float32),
            "w2": 0.02 * jax.random.normal(next(ks), (INTERMEDIATE, HIDDEN), jnp.float32),
            "b2": 0.01 * jax.random.normal(next(ks), (1, HIDDEN), jnp.float32),
        })
    params = {
        "token_embedding": 0.02 * jax.random.normal(next(ks), (VOCAB, HIDDEN), jnp.float32),
        "position_embedding": 0.02 * jax.random.normal(next(ks), (MAX_LEN, HIDDEN), jnp.float32),
        "final_ln_g": 1.0 + 0.1 * jax.random.normal(next(ks), (1, HIDDEN), jnp.float32),
        "final_ln_b": 0.1 * jax.random.normal(next(ks), (1, HIDDEN), jnp.float32),
        "text_projection": (0.02 * jax.random.normal(next(ks), (HIDDEN, HIDDEN),
                                                     jnp.float32)).astype(jnp.bfloat16),
        "stacked": _pack_layer_params(layers),
    }
    return params


# ---------------------------------------------------------------------------
# SDClipModel.forward equivalent
# ---------------------------------------------------------------------------
def _prepare_inputs(params, tokens):
    # process_tokens bookkeeping: attention mask / num_tokens -> first-EOS index
    is_end = (tokens == SPECIAL_TOKENS["end"]).astype(jnp.int32)
    after_end = jnp.cumsum(is_end, axis=1) - is_end          # >0 strictly after 1st EOS
    attention_mask = (after_end == 0).astype(jnp.int32)      # 1 up to & incl. first EOS
    num_tokens = jnp.sum(attention_mask, axis=1)
    eos_idx = (num_tokens - 1).astype(jnp.int32)
    embeds = jnp.take(params["token_embedding"], tokens, axis=0)            # [B,S,D]
    x = (embeds + params["position_embedding"][None, :, :]).astype(jnp.float32)
    return x, eos_idx


def sd_clip_forward(params, tokens):
    """tokens: int32 [B, S]  -> (z [B,S,D] f32, pooled [B,D] f32)."""
    x, eos_idx = _prepare_inputs(params, tokens)
    fin = jnp.concatenate([params["final_ln_g"], params["final_ln_b"]], axis=0)   # (2, D)
    z, pooled = run_clip_encoder(x, params["stacked"], fin,
                                 params["text_projection"], eos_idx)
    # enable_attention_masks=False, zero_out_masked=False, return_attention_masks=False
    # TODO(synk): process_tokens' per-prompt embedding injection, the 'hidden'/'all'
    # intermediate-layer options and ClipTokenWeightEncoder's token-weight
    # re-weighting are host-side Python list logic, not kernelized.
    return z.astype(jnp.float32), pooled.astype(jnp.float32)


# ---------------------------------------------------------------------------
# Pure-JAX f32 reference (same packed params) for a tolerance check.
# ---------------------------------------------------------------------------
def clip_encoder_reference(x, sp, fin, text_proj, eos_idx):
    B, S, D = x.shape
    H = HEADS
    L = sp["w1"].shape[0]
    f32 = jnp.float32
    row = jnp.arange(S)[:, None]
    col = jnp.arange(S)[None, :]
    causal = jnp.where(col > row, jnp.float32(-1e9), jnp.float32(0.0))
    h = x.astype(f32)
    for l in range(L):
        vecs = sp["vecs"][l]
        wqkv = sp["wqkv"][l].astype(f32)
        bqkv = sp["bqkv"][l].astype(f32)
        wo = sp["wo"][l].astype(f32)
        w1 = sp["w1"][l].astype(f32)
        b1 = sp["b1"][l].astype(f32)
        w2 = sp["w2"][l].astype(f32)
        h1 = _layer_norm(h, vecs[0], vecs[1])
        qkv = jnp.einsum('bsd,zde->bzse', h1, wqkv) + bqkv[None, :, None, :]
        q, k, v = qkv[:, :H], qkv[:, H:2 * H], qkv[:, 2 * H:]
        s = jnp.einsum('bhqe,bhke->bhqk', q, k) / (HEAD_DIM ** 0.5) + causal
        p = jax.nn.softmax(s, axis=-1)
        ctx = jnp.einsum('bhqk,bhke->bhqe', p, v)
        o = jnp.einsum('bhse,hed->bsd', ctx, wo) + vecs[4]
        h = h + o
        h2 = _layer_norm(h, vecs[2], vecs[3])
        m = jnp.einsum('bsd,di->bsi', h2, w1) + b1[0]
        m = m * jax.nn.sigmoid(1.702 * m)
        h = h + jnp.einsum('bsi,id->bsd', m, w2) + vecs[5]
    z = _layer_norm(h, fin[0], fin[1])
    pooled = z[jnp.arange(B), eos_idx] @ text_proj.astype(f32)
    return z, pooled


# ---------------------------------------------------------------------------
if __name__ == "__main__":
    key = jax.random.PRNGKey(0)
    params = init_params(key)

    B = 4
    mid = jax.random.randint(jax.random.fold_in(key, 999),
                             (B, MAX_LEN - 3), 4, VOCAB).astype(jnp.int32)
    start = jnp.full((B, 1), SPECIAL_TOKENS["start"], jnp.int32)
    end = jnp.full((B, 1), SPECIAL_TOKENS["end"], jnp.int32)
    pad = jnp.full((B, 1), SPECIAL_TOKENS["pad"], jnp.int32)
    tokens = jnp.concatenate([start, mid, end, pad], axis=1)           # [4, 8]

    fwd = jax.jit(functools.partial(sd_clip_forward, params))
    z, pooled = fwd(tokens)
    jax.block_until_ready((z, pooled))

    # correctness check against a pure-JAX f32 reference (loose tol: bf16 MXU
    # operands + approx-reciprocal softmax in the kernel)
    x_emb, eos_idx = _prepare_inputs(params, tokens)
    fin = jnp.concatenate([params["final_ln_g"], params["final_ln_b"]], axis=0)
    z_ref, pooled_ref = clip_encoder_reference(
        x_emb, params["stacked"], fin, params["text_projection"], eos_idx)

    assert z.shape == (B, MAX_LEN, HIDDEN) and z.dtype == jnp.float32
    assert pooled.shape == (B, HIDDEN) and pooled.dtype == jnp.float32
    assert bool(jnp.all(jnp.isfinite(z))) and bool(jnp.all(jnp.isfinite(pooled)))
    assert float(jnp.max(jnp.abs(z - z_ref))) < 7.5e-2
    assert float(jnp.max(jnp.abs(pooled - pooled_ref))) < 7.5e-2
    print("KERNEL_OK")
</pallas_src>

<mosaic_0001>
module attributes {stable_mosaic.version = 11 : i64} {
  func.func @fused_clip_kernel(%arg0: i32, %arg1: i32, %arg2: memref<4xi32, #tpu.memory_space<smem>>, %arg3: memref<2x8x32xf32, #tpu.memory_space<vmem>>, %arg4: memref<1x6x32x16xbf16, #tpu.memory_space<vmem>>, %arg5: memref<1x6x16xf32, #tpu.memory_space<vmem>>, %arg6: memref<1x2x16x32xbf16, #tpu.memory_space<vmem>>, %arg7: memref<1x32x128xbf16, #tpu.memory_space<vmem>>, %arg8: memref<1x1x128xf32, #tpu.memory_space<vmem>>, %arg9: memref<1x128x32xbf16, #tpu.memory_space<vmem>>, %arg10: memref<1x8x32xf32, #tpu.memory_space<vmem>>, %arg11: memref<2x32xf32, #tpu.memory_space<vmem>>, %arg12: memref<32x32xbf16, #tpu.memory_space<vmem>>, %arg13: memref<8x8xf32, #tpu.memory_space<vmem>>, %arg14: memref<2x8x32xf32, #tpu.memory_space<vmem>>, %arg15: memref<2x1x32xf32, #tpu.memory_space<vmem>>, %arg16: memref<16x32xf32, #tpu.memory_space<vmem>>) attributes {dimension_semantics = [#tpu.dimension_semantics<parallel>, #tpu.dimension_semantics<arbitrary>], iteration_bounds = array<i64: 2, 2>, scalar_prefetch = 1 : i64, scratch_operands = 1 : i64, tpu.core_type = #tpu.core_type<tc>, window_params = [{transform_indices = @transform_0, window_bounds = array<i64: 2, 8, 32>}, {transform_indices = @transform_1, window_bounds = array<i64: 1, 6, 32, 16>}, {transform_indices = @transform_2, window_bounds = array<i64: 1, 6, 16>}, {transform_indices = @transform_3, window_bounds = array<i64: 1, 2, 16, 32>}, {transform_indices = @transform_4, window_bounds = array<i64: 1, 32, 128>}, {transform_indices = @transform_5, window_bounds = array<i64: 1, 1, 128>}, {transform_indices = @transform_6, window_bounds = array<i64: 1, 128, 32>}, {transform_indices = @transform_7, window_bounds = array<i64: 1, 8, 32>}, {pipeline_mode = #tpu.pipeline_mode<synchronous>, transform_indices = @transform_8, window_bounds = array<i64: 2, 32>}, {pipeline_mode = #tpu.pipeline_mode<synchronous>, transform_indices = @transform_9, window_bounds = array<i64: 32, 32>}, {pipeline_mode = #tpu.pipeline_mode<synchronous>, transform_indices = @transform_10, window_bounds = array<i64: 8, 8>}, {transform_indices = @transform_11, window_bounds = array<i64: 2, 8, 32>}, {transform_indices = @transform_12, window_bounds = array<i64: 2, 1, 32>}]} {
    %c0_i32 = arith.constant 0 : i32
    %0 = arith.cmpi eq, %arg1, %c0_i32 : i32
    %1 = arith.extui %0 : i1 to i32
    %c0_i32_0 = arith.constant 0 : i32
    %2 = arith.cmpi ne, %1, %c0_i32_0 : i32
    scf.if %2 {
      %c0_59 = arith.constant 0 : index
      %c0_60 = arith.constant 0 : index
      %c0_61 = arith.constant 0 : index
      %158 = vector.load %arg3[%c0_59, %c0_60, %c0_61] : memref<2x8x32xf32, #tpu.memory_space<vmem>>, vector<2x8x32xf32>
      %159 = vector.shape_cast %158 : vector<2x8x32xf32> to vector<16x32xf32>
      %c0_62 = arith.constant 0 : index
      %c0_63 = arith.constant 0 : index
      %160 = vector.load %arg16[%c0_62, %c0_63] : memref<16x32xf32, #tpu.memory_space<vmem>>, vector<16x32xf32>
      tpu.vector_store %arg16[%c0_62, %c0_63], %159 {strides = array<i32>} : memref<16x32xf32, #tpu.memory_space<vmem>>, vector<16x32xf32>,
    } else {
    }
    %c0 = arith.constant 0 : index
    %c0_1 = arith.constant 0 : index
    %3 = vector.load %arg16[%c0, %c0_1] : memref<16x32xf32, #tpu.memory_space<vmem>>, vector<16x32xf32>
    %c0_2 = arith.constant 0 : index
    %c0_3 = arith.constant 0 : index
    %c0_4 = arith.constant 0 : index
    %4 = vector.load %arg10[%c0_2, %c0_3, %c0_4] : memref<1x8x32xf32, #tpu.memory_space<vmem>>, vector<1x8x32xf32>
    %5 = vector.shape_cast %4 : vector<1x8x32xf32> to vector<8x32xf32>
    %6 = vector.extract_strided_slice %5 {offsets = [0, 0], sizes = [1, 32], strides = [1, 1]} : vector<8x32xf32> to vector<1x32xf32>
    %7 = vector.extract_strided_slice %5 {offsets = [1, 0], sizes = [1, 32], strides = [1, 1]} : vector<8x32xf32> to vector<1x32xf32>
    %8 = vector.extract_strided_slice %5 {offsets = [2, 0], sizes = [1, 32], strides = [1, 1]} : vector<8x32xf32> to vector<1x32xf32>
    %9 = vector.extract_strided_slice %5 {offsets = [3, 0], sizes = [1, 32], strides = [1, 1]} : vector<8x32xf32> to vector<1x32xf32>
    %10 = vector.extract_strided_slice %5 {offsets = [4, 0], sizes = [1, 32], strides = [1, 1]} : vector<8x32xf32> to vector<1x32xf32>
    %11 = vector.extract_strided_slice %5 {offsets = [5, 0], sizes = [1, 32], strides = [1, 1]} : vector<8x32xf32> to vector<1x32xf32>
    %cst = arith.constant dense<0.000000e+00> : vector<16xf32>
    %12 = vector.multi_reduction <add>, %3, %cst [1] : vector<16x32xf32> to vector<16xf32>
    %13 = vector.shape_cast %12 : vector<16xf32> to vector<16x1xf32>
    %cst_5 = arith.constant 3.200000e+01 : f32
    %14 = vector.broadcast %cst_5 : f32 to vector<16x1xf32>
    %15 = arith.divf %13, %14 : vector<16x1xf32>
    %16 = vector.broadcast %15 : vector<16x1xf32> to vector<16x32xf32>
    %17 = arith.subf %3, %16 : vector<16x32xf32>
    %18 = arith.mulf %17, %17 : vector<16x32xf32>
    %cst_6 = arith.constant dense<0.000000e+00> : vector<16xf32>
    %19 = vector.multi_reduction <add>, %18, %cst_6 [1] : vector<16x32xf32> to vector<16xf32>
    %20 = vector.shape_cast %19 : vector<16xf32> to vector<16x1xf32>
    %cst_7 = arith.constant 3.200000e+01 : f32
    %21 = vector.broadcast %cst_7 : f32 to vector<16x1xf32>
    %22 = arith.divf %20, %21 : vector<16x1xf32>
    %cst_8 = arith.constant 9.99999974E-6 : f32
    %23 = vector.broadcast %cst_8 : f32 to vector<16x1xf32>
    %24 = arith.addf %22, %23 : vector<16x1xf32>
    %25 = math.rsqrt %24 : vector<16x1xf32>
    %26 = vector.broadcast %25 : vector<16x1xf32> to vector<16x32xf32>
    %27 = arith.mulf %17, %26 : vector<16x32xf32>
    %28 = vector.broadcast %6 : vector<1x32xf32> to vector<16x32xf32>
    %29 = arith.mulf %27, %28 : vector<16x32xf32>
    %30 = vector.broadcast %7 : vector<1x32xf32> to vector<16x32xf32>
    %31 = arith.addf %29, %30 : vector<16x32xf32>
    %32 = arith.truncf %31 : vector<16x32xf32> to vector<16x32xbf16>
    %c0_9 = arith.constant 0 : index
    %c0_10 = arith.constant 0 : index
    %c0_11 = arith.constant 0 : index
    %c0_12 = arith.constant 0 : index
    %33 = vector.load %arg4[%c0_9, %c0_10, %c0_11, %c0_12] : memref<1x6x32x16xbf16, #tpu.memory_space<vmem>>, vector<1x6x32x16xbf16>
    %34 = vector.shape_cast %33 : vector<1x6x32x16xbf16> to vector<6x32x16xbf16>
    %c0_13 = arith.constant 0 : index
    %c0_14 = arith.constant 0 : index
    %c0_15 = arith.constant 0 : index
    %35 = vector.load %arg5[%c0_13, %c0_14, %c0_15] : memref<1x6x16xf32, #tpu.memory_space<vmem>>, vector<1x6x16xf32>
    %36 = vector.shape_cast %35 : vector<1x6x16xf32> to vector<6x16xf32>
    %37 = vector.shape_cast %36 : vector<6x16xf32> to vector<6x1x16xf32>
    %c0_16 = arith.constant 0 : index
    %c0_17 = arith.constant 0 : index
    %c0_18 = arith.constant 0 : index
    %c0_19 = arith.constant 0 : index
    %38 = vector.load %arg6[%c0_16, %c0_17, %c0_18, %c0_19] : memref<1x2x16x32xbf16, #tpu.memory_space<vmem>>, vector<1x2x16x32xbf16>
    %39 = vector.shape_cast %38 : vector<1x2x16x32xbf16> to vector<2x16x32xbf16>
    %c0_20 = arith.constant 0 : index
    %c0_21 = arith.constant 0 : index
    %40 = vector.load %arg13[%c0_20, %c0_21] : memref<8x8xf32, #tpu.memory_space<vmem>>, vector<8x8xf32>
    %41 = vector.extract_strided_slice %32 {offsets = [0, 0], sizes = [8, 32], strides = [1, 1]} : vector<16x32xbf16> to vector<8x32xbf16>
    %42 = vector.shape_cast %41 : vector<8x32xbf16> to vector<1x8x32xbf16>
    %43 = vector.broadcast %42 : vector<1x8x32xbf16> to vector<6x8x32xbf16>
    "tpu.trace_start"() <{level = 10 : i32, message = "zsd,zde->zse"}> : () -> ()
    %cst_22 = arith.constant dense<0.000000e+00> : vector<6x8x16xf32>
    %44 = tpu.matmul %43, %34, %cst_22 {dimension_numbers = #tpu.dot_dimension_numbers<[2], [1], [1], [2], [0, 0, 0, 1, 1, 2], [0], [0]>} : vector<6x8x32xbf16>, vector<6x32x16xbf16>, vector<6x8x16xf32> -> vector<6x8x16xf32>
    "tpu.trace_stop"() : () -> ()
    %45 = vector.broadcast %37 : vector<6x1x16xf32> to vector<6x8x16xf32>
    %46 = arith.addf %44, %45 : vector<6x8x16xf32>
    %47 = vector.extract_strided_slice %46 {offsets = [0, 0, 0], sizes = [2, 8, 16], strides = [1, 1, 1]} : vector<6x8x16xf32> to vector<2x8x16xf32>
    %48 = vector.extract_strided_slice %46 {offsets = [2, 0, 0], sizes = [2, 8, 16], strides = [1, 1, 1]} : vector<6x8x16xf32> to vector<2x8x16xf32>
    %49 = vector.extract_strided_slice %46 {offsets = [4, 0, 0], sizes = [2, 8, 16], strides = [1, 1, 1]} : vector<6x8x16xf32> to vector<2x8x16xf32>
    %50 = arith.truncf %47 : vector<2x8x16xf32> to vector<2x8x16xbf16>
    %51 = arith.truncf %48 : vector<2x8x16xf32> to vector<2x8x16xbf16>
    "tpu.trace_start"() <{level = 10 : i32, message = "hqe,hke->hqk"}> : () -> ()
    %cst_23 = arith.constant dense<0.000000e+00> : vector<2x8x8xf32>
    %52 = tpu.matmul %50, %51, %cst_23 {dimension_numbers = #tpu.dot_dimension_numbers<[2], [2], [1], [1], [0, 0, 0, 1, 1, 1], [0], [0]>} : vector<2x8x16xbf16>, vector<2x8x16xbf16>, vector<2x8x8xf32> -> vector<2x8x8xf32>
    "tpu.trace_stop"() : () -> ()
    %cst_24 = arith.constant 2.500000e-01 : f32
    %53 = vector.broadcast %cst_24 : f32 to vector<2x8x8xf32>
    %54 = arith.mulf %52, %53 : vector<2x8x8xf32>
    %55 = vector.shape_cast %40 : vector<8x8xf32> to vector<1x8x8xf32>
    %56 = vector.broadcast %55 : vector<1x8x8xf32> to vector<2x8x8xf32>
    %57 = arith.addf %54, %56 : vector<2x8x8xf32>
    %cst_25 = arith.constant dense<0xFF800000> : vector<2x8xf32>
    %58 = vector.multi_reduction <maximumf>, %57, %cst_25 [2] : vector<2x8x8xf32> to vector<2x8xf32>
    %59 = vector.shape_cast %58 : vector<2x8xf32> to vector<2x8x1xf32>
    %60 = vector.broadcast %59 : vector<2x8x1xf32> to vector<2x8x8xf32>
    %61 = arith.subf %57, %60 : vector<2x8x8xf32>
    %62 = math.exp %61 : vector<2x8x8xf32>
    %cst_26 = arith.constant dense<0.000000e+00> : vector<2x8xf32>
    %63 = vector.multi_reduction <add>, %62, %cst_26 [2] : vector<2x8x8xf32> to vector<2x8xf32>
    %64 = vector.shape_cast %63 : vector<2x8xf32> to vector<2x8x1xf32>
    %65 = tpu.reciprocal %64 {approx = true} : vector<2x8x1xf32> -> vector<2x8x1xf32>
    %66 = vector.broadcast %65 : vector<2x8x1xf32> to vector<2x8x8xf32>
    %67 = arith.mulf %62, %66 : vector<2x8x8xf32>
    %68 = arith.truncf %67 : vector<2x8x8xf32> to vector<2x8x8xbf16>
    %69 = arith.truncf %49 : vector<2x8x16xf32> to vector<2x8x16xbf16>
    "tpu.trace_start"() <{level = 10 : i32, message = "hqk,hke->hqe"}> : () -> ()
    %cst_27 = arith.constant dense<0.000000e+00> : vector<2x8x16xf32>
    %70 = tpu.matmul %68, %69, %cst_27 {dimension_numbers = #tpu.dot_dimension_numbers<[2], [1], [1], [2], [0, 0, 0, 1, 1, 2], [0], [0]>} : vector<2x8x8xbf16>, vector<2x8x16xbf16>, vector<2x8x16xf32> -> vector<2x8x16xf32>
    "tpu.trace_stop"() : () -> ()
    %71 = arith.truncf %70 : vector<2x8x16xf32> to vector<2x8x16xbf16>
    "tpu.trace_start"() <{level = 10 : i32, message = "hse,hed->hsd"}> : () -> ()
    %cst_28 = arith.constant dense<0.000000e+00> : vector<2x8x32xf32>
    %72 = tpu.matmul %71, %39, %cst_28 {dimension_numbers = #tpu.dot_dimension_numbers<[2], [1], [1], [2], [0, 0, 0, 1, 1, 2], [0], [0]>} : vector<2x8x16xbf16>, vector<2x16x32xbf16>, vector<2x8x32xf32> -> vector<2x8x32xf32>
    "tpu.trace_stop"() : () -> ()
    %cst_29 = arith.constant dense<0.000000e+00> : vector<8x32xf32>
    %73 = vector.multi_reduction <add>, %72, %cst_29 [0] : vector<2x8x32xf32> to vector<8x32xf32>
    %74 = vector.extract_strided_slice %32 {offsets = [8, 0], sizes = [8, 32], strides = [1, 1]} : vector<16x32xbf16> to vector<8x32xbf16>
    %75 = vector.shape_cast %74 : vector<8x32xbf16> to vector<1x8x32xbf16>
    %76 = vector.broadcast %75 : vector<1x8x32xbf16> to vector<6x8x32xbf16>
    "tpu.trace_start"() <{level = 10 : i32, message = "zsd,zde->zse"}> : () -> ()
    %cst_30 = arith.constant dense<0.000000e+00> : vector<6x8x16xf32>
    %77 = tpu.matmul %76, %34, %cst_30 {dimension_numbers = #tpu.dot_dimension_numbers<[2], [1], [1], [2], [0, 0, 0, 1, 1, 2], [0], [0]>} : vector<6x8x32xbf16>, vector<6x32x16xbf16>, vector<6x8x16xf32> -> vector<6x8x16xf32>
    "tpu.trace_stop"() : () -> ()
    %78 = vector.broadcast %37 : vector<6x1x16xf32> to vector<6x8x16xf32>
    %79 = arith.addf %77, %78 : vector<6x8x16xf32>
    %80 = vector.extract_strided_slice %79 {offsets = [0, 0, 0], sizes = [2, 8, 16], strides = [1, 1, 1]} : vector<6x8x16xf32> to vector<2x8x16xf32>
    %81 = vector.extract_strided_slice %79 {offsets = [2, 0, 0], sizes = [2, 8, 16], strides = [1, 1, 1]} : vector<6x8x16xf32> to vector<2x8x16xf32>
    %82 = vector.extract_strided_slice %79 {offsets = [4, 0, 0], sizes = [2, 8, 16], strides = [1, 1, 1]} : vector<6x8x16xf32> to vector<2x8x16xf32>
    %83 = arith.truncf %80 : vector<2x8x16xf32> to vector<2x8x16xbf16>
    %84 = arith.truncf %81 : vector<2x8x16xf32> to vector<2x8x16xbf16>
    "tpu.trace_start"() <{level = 10 : i32, message = "hqe,hke->hqk"}> : () -> ()
    %cst_31 = arith.constant dense<0.000000e+00> : vector<2x8x8xf32>
    %85 = tpu.matmul %83, %84, %cst_31 {dimension_numbers = #tpu.dot_dimension_numbers<[2], [2], [1], [1], [0, 0, 0, 1, 1, 1], [0], [0]>} : vector<2x8x16xbf16>, vector<2x8x16xbf16>, vector<2x8x8xf32> -> vector<2x8x8xf32>
    "tpu.trace_stop"() : () -> ()
    %cst_32 = arith.constant 2.500000e-01 : f32
    %86 = vector.broadcast %cst_32 : f32 to vector<2x8x8xf32>
    %87 = arith.mulf %85, %86 : vector<2x8x8xf32>
    %88 = vector.shape_cast %40 : vector<8x8xf32> to vector<1x8x8xf32>
    %89 = vector.broadcast %88 : vector<1x8x8xf32> to vector<2x8x8xf32>
    %90 = arith.addf %87, %89 : vector<2x8x8xf32>
    %cst_33 = arith.constant dense<0xFF800000> : vector<2x8xf32>
    %91 = vector.multi_reduction <maximumf>, %90, %cst_33 [2] : vector<2x8x8xf32> to vector<2x8xf32>
    %92 = vector.shape_cast %91 : vector<2x8xf32> to vector<2x8x1xf32>
    %93 = vector.broadcast %92 : vector<2x8x1xf32> to vector<2x8x8xf32>
    %94 = arith.subf %90, %93 : vector<2x8x8xf32>
    %95 = math.exp %94 : vector<2x8x8xf32>
    %cst_34 = arith.constant dense<0.000000e+00> : vector<2x8xf32>
    %96 = vector.multi_reduction <add>, %95, %cst_34 [2] : vector<2x8x8xf32> to vector<2x8xf32>
    %97 = vector.shape_cast %96 : vector<2x8xf32> to vector<2x8x1xf32>
    %98 = tpu.reciprocal %97 {approx = true} : vector<2x8x1xf32> -> vector<2x8x1xf32>
    %99 = vector.broadcast %98 : vector<2x8x1xf32> to vector<2x8x8xf32>
    %100 = arith.mulf %95, %99 : vector<2x8x8xf32>
    %101 = arith.truncf %100 : vector<2x8x8xf32> to vector<2x8x8xbf16>
    %102 = arith.truncf %82 : vector<2x8x16xf32> to vector<2x8x16xbf16>
    "tpu.trace_start"() <{level = 10 : i32, message = "hqk,hke->hqe"}> : () -> ()
    %cst_35 = arith.constant dense<0.000000e+00> : vector<2x8x16xf32>
    %103 = tpu.matmul %101, %102, %cst_35 {dimension_numbers = #tpu.dot_dimension_numbers<[2], [1], [1], [2], [0, 0, 0, 1, 1, 2], [0], [0]>} : vector<2x8x8xbf16>, vector<2x8x16xbf16>, vector<2x8x16xf32> -> vector<2x8x16xf32>
    "tpu.trace_stop"() : () -> ()
    %104 = arith.truncf %103 : vector<2x8x16xf32> to vector<2x8x16xbf16>
    "tpu.trace_start"() <{level = 10 : i32, message = "hse,hed->hsd"}> : () -> ()
    %cst_36 = arith.constant dense<0.000000e+00> : vector<2x8x32xf32>
    %105 = tpu.matmul %104, %39, %cst_36 {dimension_numbers = #tpu.dot_dimension_numbers<[2], [1], [1], [2], [0, 0, 0, 1, 1, 2], [0], [0]>} : vector<2x8x16xbf16>, vector<2x16x32xbf16>, vector<2x8x32xf32> -> vector<2x8x32xf32>
    "tpu.trace_stop"() : () -> ()
    %cst_37 = arith.constant dense<0.000000e+00> : vector<8x32xf32>
    %106 = vector.multi_reduction <add>, %105, %cst_37 [0] : vector<2x8x32xf32> to vector<8x32xf32>
    %107 = tpu.concatenate %73, %106 in 0 : vector<8x32xf32>, vector<8x32xf32> -> vector<16x32xf32>
    %108 = arith.addf %3, %107 : vector<16x32xf32>
    %109 = vector.broadcast %10 : vector<1x32xf32> to vector<16x32xf32>
    %110 = arith.addf %108, %109 : vector<16x32xf32>
    %cst_38 = arith.constant dense<0.000000e+00> : vector<16xf32>
    %111 = vector.multi_reduction <add>, %110, %cst_38 [1] : vector<16x32xf32> to vector<16xf32>
    %112 = vector.shape_cast %111 : vector<16xf32> to vector<16x1xf32>
    %cst_39 = arith.constant 3.200000e+01 : f32
    %113 = vector.broadcast %cst_39 : f32 to vector<16x1xf32>
    %114 = arith.divf %112, %113 : vector<16x1xf32>
    %115 = vector.broadcast %114 : vector<16x1xf32> to vector<16x32xf32>
    %116 = arith.subf %110, %115 : vector<16x32xf32>
    %117 = arith.mulf %116, %116 : vector<16x32xf32>
    %cst_40 = arith.constant dense<0.000000e+00> : vector<16xf32>
    %118 = vector.multi_reduction <add>, %117, %cst_40 [1] : vector<16x32xf32> to vector<16xf32>
    %119 = vector.shape_cast %118 : vector<16xf32> to vector<16x1xf32>
    %cst_41 = arith.constant 3.200000e+01 : f32
    %120 = vector.broadcast %cst_41 : f32 to vector<16x1xf32>
    %121 = arith.divf %119, %120 : vector<16x1xf32>
    %cst_42 = arith.constant 9.99999974E-6 : f32
    %122 = vector.broadcast %cst_42 : f32 to vector<16x1xf32>
    %123 = arith.addf %121, %122 : vector<16x1xf32>
    %124 = math.rsqrt %123 : vector<16x1xf32>
    %125 = vector.broadcast %124 : vector<16x1xf32> to vector<16x32xf32>
    %126 = arith.mulf %116, %125 : vector<16x32xf32>
    %127 = vector.broadcast %8 : vector<1x32xf32> to vector<16x32xf32>
    %128 = arith.mulf %126, %127 : vector<16x32xf32>
    %129 = vector.broadcast %9 : vector<1x32xf32> to vector<16x32xf32>
    %130 = arith.addf %128, %129 : vector<16x32xf32>
    %131 = arith.truncf %130 : vector<16x32xf32> to vector<16x32xbf16>
    %c0_43 = arith.constant 0 : index
    %c0_44 = arith.constant 0 : index
    %c0_45 = arith.constant 0 : index
    %132 = vector.load %arg7[%c0_43, %c0_44, %c0_45] : memref<1x32x128xbf16, #tpu.memory_space<vmem>>, vector<1x32x128xbf16>
    %133 = vector.shape_cast %132 : vector<1x32x128xbf16> to vector<32x128xbf16>
    %cst_46 = arith.constant dense<0.000000e+00> : vector<16x128xf32>
    %134 = tpu.matmul %131, %133, %cst_46 {dimension_numbers = #tpu.dot_dimension_numbers<[1], [0], [0], [1], [0, 0, 1, 1], [], []>} : vector<16x32xbf16>, vector<32x128xbf16>, vector<16x128xf32> -> vector<16x128xf32>
    %c0_47 = arith.constant 0 : index
    %c0_48 = arith.constant 0 : index
    %c0_49 = arith.constant 0 : index
    %135 = vector.load %arg8[%c0_47, %c0_48, %c0_49] : memref<1x1x128xf32, #tpu.memory_space<vmem>>, vector<1x1x128xf32>
    %136 = vector.shape_cast %135 : vector<1x1x128xf32> to vector<1x128xf32>
    %137 = vector.broadcast %136 : vector<1x128xf32> to vector<16x128xf32>
    %138 = arith.addf %134, %137 : vector<16x128xf32>
    %cst_50 = arith.constant 1.702000e+00 : f32
    %139 = vector.broadcast %cst_50 : f32 to vector<16x128xf32>
    %140 = arith.mulf %139, %138 : vector<16x128xf32>
    %141 = arith.negf %140 : vector<16x128xf32>
    %142 = math.exp %141 : vector<16x128xf32>
    %cst_51 = arith.constant 1.000000e+00 : f32
    %143 = vector.broadcast %cst_51 : f32 to vector<16x128xf32>
    %144 = arith.addf %143, %142 : vector<16x128xf32>
    %145 = arith.divf %143, %144 : vector<16x128xf32>
    %146 = arith.mulf %138, %145 : vector<16x128xf32>
    %147 = arith.truncf %146 : vector<16x128xf32> to vector<16x128xbf16>
    %c0_52 = arith.constant 0 : index
    %c0_53 = arith.constant 0 : index
    %c0_54 = arith.constant 0 : index
    %148 = vector.load %arg9[%c0_52, %c0_53, %c0_54] : memref<1x128x32xbf16, #tpu.memory_space<vmem>>, vector<1x128x32xbf16>
    %149 = vector.shape_cast %148 : vector<1x128x32xbf16> to vector<128x32xbf16>
    %cst_55 = arith.constant dense<0.000000e+00> : vector<16x32xf32>
    %150 = tpu.matmul %147, %149, %cst_55 {dimension_numbers = #tpu.dot_dimension_numbers<[1], [0], [0], [1], [0, 0, 1, 1], [], []>} : vector<16x128xbf16>, vector<128x32xbf16>, vector<16x32xf32> -> vector<16x32xf32>
    %151 = vector.broadcast %11 : vector<1x32xf32> to vector<16x32xf32>
    %152 = arith.addf %150, %151 : vector<16x32xf32>
    %153 = arith.addf %110, %152 : vector<16x32xf32>
    %c0_56 = arith.constant 0 : index
    %c0_57 = arith.constant 0 : index
    %154 = vector.load %arg16[%c0_56, %c0_57] : memref<16x32xf32, #tpu.memory_space<vmem>>, vector<16x32xf32>
    tpu.vector_store %arg16[%c0_56, %c0_57], %153 {strides = array<i32>} : memref<16x32xf32, #tpu.memory_space<vmem>>, vector<16x32xf32>,
    %c1_i32 = arith.constant 1 : i32
    %155 = arith.cmpi eq, %arg1, %c1_i32 : i32
    %156 = arith.extui %155 : i1 to i32
    %c0_i32_58 = arith.constant 0 : i32
    %157 = arith.cmpi ne, %156, %c0_i32_58 : i32
    scf.if %157 {
      %c0_59 = arith.constant 0 : index
      %c0_60 = arith.constant 0 : index
      %158 = vector.load %arg11[%c0_59, %c0_60] : memref<2x32xf32, #tpu.memory_space<vmem>>, vector<1x32xf32>
      %c1 = arith.constant 1 : index
      %c0_61 = arith.constant 0 : index
      %159 = vector.load %arg11[%c1, %c0_61] : memref<2x32xf32, #tpu.memory_space<vmem>>, vector<1x32xf32>
      %cst_62 = arith.constant dense<0.000000e+00> : vector<16xf32>
      %160 = vector.multi_reduction <add>, %153, %cst_62 [1] : vector<16x32xf32> to vector<16xf32>
      %161 = vector.shape_cast %160 : vector<16xf32> to vector<16x1xf32>
      %cst_63 = arith.constant 3.200000e+01 : f32
      %162 = vector.broadcast %cst_63 : f32 to vector<16x1xf32>
      %163 = arith.divf %161, %162 : vector<16x1xf32>
      %164 = vector.broadcast %163 : vector<16x1xf32> to vector<16x32xf32>
      %165 = arith.subf %153, %164 : vector<16x32xf32>
      %166 = arith.mulf %165, %165 : vector<16x32xf32>
      %cst_64 = arith.constant dense<0.000000e+00> : vector<16xf32>
      %167 = vector.multi_reduction <add>, %166, %cst_64 [1] : vector<16x32xf32> to vector<16xf32>
      %168 = vector.shape_cast %167 : vector<16xf32> to vector<16x1xf32>
      %cst_65 = arith.constant 3.200000e+01 : f32
      %169 = vector.broadcast %cst_65 : f32 to vector<16x1xf32>
      %170 = arith.divf %168, %169 : vector<16x1xf32>
      %cst_66 = arith.constant 9.99999974E-6 : f32
      %171 = vector.broadcast %cst_66 : f32 to vector<16x1xf32>
      %172 = arith.addf %170, %171 : vector<16x1xf32>
      %173 = math.rsqrt %172 : vector<16x1xf32>
      %174 = vector.broadcast %173 : vector<16x1xf32> to vector<16x32xf32>
      %175 = arith.mulf %165, %174 : vector<16x32xf32>
      %176 = vector.broadcast %158 : vector<1x32xf32> to vector<16x32xf32>
      %177 = arith.mulf %175, %176 : vector<16x32xf32>
      %178 = vector.broadcast %159 : vector<1x32xf32> to vector<16x32xf32>
      %179 = arith.addf %177, %178 : vector<16x32xf32>
      %180 = vector.shape_cast %179 : vector<16x32xf32> to vector<2x8x32xf32>
      %c0_67 = arith.constant 0 : index
      %c0_68 = arith.constant 0 : index
      %c0_69 = arith.constant 0 : index
      %181 = vector.load %arg14[%c0_67, %c0_68, %c0_69] : memref<2x8x32xf32, #tpu.memory_space<vmem>>, vector<2x8x32xf32>
      tpu.vector_store %arg14[%c0_67, %c0_68, %c0_69], %180 {strides = array<i32>} : memref<2x8x32xf32, #tpu.memory_space<vmem>>, vector<2x8x32xf32>,
      %c0_70 = arith.constant 0 : index
      %c0_71 = arith.constant 0 : index
      %182 = vector.load %arg12[%c0_70, %c0_71] : memref<32x32xbf16, #tpu.memory_space<vmem>>, vector<32x32xbf16>
      %c2_i32 = arith.constant 2 : i32
      %183 = arith.muli %arg0, %c2_i32 : i32
      %c0_i32_72 = arith.constant 0 : i32
      %184 = arith.addi %183, %c0_i32_72 : i32
      %185 = arith.index_cast %184 : i32 to index
      %186 = memref.load %arg2[%185] : memref<4xi32, #tpu.memory_space<smem>>
      %c0_i32_73 = arith.constant 0 : i32
      %187 = arith.addi %c0_i32_73, %186 : i32
      %188 = arith.index_cast %187 : i32 to index
      %c0_74 = arith.constant 0 : index
      %189 = vector.load %arg16[%188, %c0_74] : memref<16x32xf32, #tpu.memory_space<vmem>>, vector<1x32xf32>
      %cst_75 = arith.constant dense<0.000000e+00> : vector<1xf32>
      %190 = vector.multi_reduction <add>, %189, %cst_75 [1] : vector<1x32xf32> to vector<1xf32>
      %191 = vector.shape_cast %190 : vector<1xf32> to vector<1x1xf32>
      %cst_76 = arith.constant 3.200000e+01 : f32
      %192 = vector.broadcast %cst_76 : f32 to vector<1x1xf32>
      %193 = arith.divf %191, %192 : vector<1x1xf32>
      %194 = vector.broadcast %193 : vector<1x1xf32> to vector<1x32xf32>
      %195 = arith.subf %189, %194 : vector<1x32xf32>
      %196 = arith.mulf %195, %195 : vector<1x32xf32>
      %cst_77 = arith.constant dense<0.000000e+00> : vector<1xf32>
      %197 = vector.multi_reduction <add>, %196, %cst_77 [1] : vector<1x32xf32> to vector<1xf32>
      %198 = vector.shape_cast %197 : vector<1xf32> to vector<1x1xf32>
      %cst_78 = arith.constant 3.200000e+01 : f32
      %199 = vector.broadcast %cst_78 : f32 to vector<1x1xf32>
      %200 = arith.divf %198, %199 : vector<1x1xf32>
      %cst_79 = arith.constant 9.99999974E-6 : f32
      %201 = vector.broadcast %cst_79 : f32 to vector<1x1xf32>
      %202 = arith.addf %200, %201 : vector<1x1xf32>
      %203 = math.rsqrt %202 : vector<1x1xf32>
      %204 = vector.broadcast %203 : vector<1x1xf32> to vector<1x32xf32>
      %205 = arith.mulf %195, %204 : vector<1x32xf32>
      %206 = arith.mulf %205, %158 : vector<1x32xf32>
      %207 = arith.addf %206, %159 : vector<1x32xf32>
      %208 = arith.truncf %207 : vector<1x32xf32> to vector<1x32xbf16>
      %cst_80 = arith.constant dense<0.000000e+00> : vector<1x32xf32>
      %209 = tpu.matmul %208, %182, %cst_80 {dimension_numbers = #tpu.dot_dimension_numbers<[1], [0], [0], [1], [0, 0, 1, 1], [], []>} : vector<1x32xbf16>, vector<32x32xbf16>, vector<1x32xf32> -> vector<1x32xf32>
      %210 = vector.shape_cast %209 : vector<1x32xf32> to vector<1x1x32xf32>
      %c0_81 = arith.constant 0 : index
      %c0_82 = arith.constant 0 : index
      %c0_83 = arith.constant 0 : index
      %211 = vector.load %arg15[%c0_81, %c0_82, %c0_83] : memref<2x1x32xf32, #tpu.memory_space<vmem>>, vector<1x1x32xf32>
      tpu.vector_store %arg15[%c0_81, %c0_82, %c0_83], %210 {strides = array<i32>} : memref<2x1x32xf32, #tpu.memory_space<vmem>>, vector<1x1x32xf32>,
      %c2_i32_84 = arith.constant 2 : i32
      %212 = arith.muli %arg0, %c2_i32_84 : i32
      %c1_i32_85 = arith.constant 1 : i32
      %213 = arith.addi %212, %c1_i32_85 : i32
      %214 = arith.index_cast %213 : i32 to index
      %215 = memref.load %arg2[%214] : memref<4xi32, #tpu.memory_space<smem>>
      %c8_i32 = arith.constant 8 : i32
      %216 = arith.addi %c8_i32, %215 : i32
      %217 = arith.index_cast %216 : i32 to index
      %c0_86 = arith.constant 0 : index
      %218 = vector.load %arg16[%217, %c0_86] : memref<16x32xf32, #tpu.memory_space<vmem>>, vector<1x32xf32>
      %cst_87 = arith.constant dense<0.000000e+00> : vector<1xf32>
      %219 = vector.multi_reduction <add>, %218, %cst_87 [1] : vector<1x32xf32> to vector<1xf32>
      %220 = vector.shape_cast %219 : vector<1xf32> to vector<1x1xf32>
      %cst_88 = arith.constant 3.200000e+01 : f32
      %221 = vector.broadcast %cst_88 : f32 to vector<1x1xf32>
      %222 = arith.divf %220, %221 : vector<1x1xf32>
      %223 = vector.broadcast %222 : vector<1x1xf32> to vector<1x32xf32>
      %224 = arith.subf %218, %223 : vector<1x32xf32>
      %225 = arith.mulf %224, %224 : vector<1x32xf32>
      %cst_89 = arith.constant dense<0.000000e+00> : vector<1xf32>
      %226 = vector.multi_reduction <add>, %225, %cst_89 [1] : vector<1x32xf32> to vector<1xf32>
      %227 = vector.shape_cast %226 : vector<1xf32> to vector<1x1xf32>
      %cst_90 = arith.constant 3.200000e+01 : f32
      %228 = vector.broadcast %cst_90 : f32 to vector<1x1xf32>
      %229 = arith.divf %227, %228 : vector<1x1xf32>
      %cst_91 = arith.constant 9.99999974E-6 : f32
      %230 = vector.broadcast %cst_91 : f32 to vector<1x1xf32>
      %231 = arith.addf %229, %230 : vector<1x1xf32>
      %232 = math.rsqrt %231 : vector<1x1xf32>
      %233 = vector.broadcast %232 : vector<1x1xf32> to vector<1x32xf32>
      %234 = arith.mulf %224, %233 : vector<1x32xf32>
      %235 = arith.mulf %234, %158 : vector<1x32xf32>
      %236 = arith.addf %235, %159 : vector<1x32xf32>
      %237 = arith.truncf %236 : vector<1x32xf32> to vector<1x32xbf16>
      %cst_92 = arith.constant dense<0.000000e+00> : vector<1x32xf32>
      %238 = tpu.matmul %237, %182, %cst_92 {dimension_numbers = #tpu.dot_dimension_numbers<[1], [0], [0], [1], [0, 0, 1, 1], [], []>} : vector<1x32xbf16>, vector<32x32xbf16>, vector<1x32xf32> -> vector<1x32xf32>
      %239 = vector.shape_cast %238 : vector<1x32xf32> to vector<1x1x32xf32>
      %c1_93 = arith.constant 1 : index
      %c0_94 = arith.constant 0 : index
      %c0_95 = arith.constant 0 : index
      %240 = vector.load %arg15[%c1_93, %c0_94, %c0_95] : memref<2x1x32xf32, #tpu.memory_space<vmem>>, vector<1x1x32xf32>
      tpu.vector_store %arg15[%c1_93, %c0_94, %c0_95], %239 {strides = array<i32>} : memref<2x1x32xf32, #tpu.memory_space<vmem>>, vector<1x1x32xf32>,
    } else {
    }
    return
  }
  func.func @transform_0(%arg0: i32, %arg1: i32, %arg2: memref<4xi32, #tpu.memory_space<smem>>) -> (i32, i32, i32) {
    %c0_i32 = arith.constant 0 : i32
    %c0_i32_0 = arith.constant 0 : i32
    %c0_i32_1 = arith.constant 0 : i32
    return %arg0, %c0_i32, %c0_i32_0 : i32, i32, i32
  }
  func.func @transform_1(%arg0: i32, %arg1: i32, %arg2: memref<4xi32, #tpu.memory_space<smem>>) -> (i32, i32, i32, i32) {
    %c0_i32 = arith.constant 0 : i32
    %c0_i32_0 = arith.constant 0 : i32
    %c0_i32_1 = arith.constant 0 : i32
    %c0_i32_2 = arith.constant 0 : i32
    return %arg1, %c0_i32, %c0_i32_0, %c0_i32_1 : i32, i32, i32, i32
  }
  func.func @transform_2(%arg0: i32, %arg1: i32, %arg2: memref<4xi32, #tpu.memory_space<smem>>) -> (i32, i32, i32) {
    %c0_i32 = arith.constant 0 : i32
    %c0_i32_0 = arith.constant 0 : i32
    %c0_i32_1 = arith.constant 0 : i32
    return %arg1, %c0_i32, %c0_i32_0 : i32, i32, i32
  }
  func.func @transform_3(%arg0: i32, %arg1: i32, %arg2: memref<4xi32, #tpu.memory_space<smem>>) -> (i32, i32, i32, i32) {
    %c0_i32 = arith.constant 0 : i32
    %c0_i32_0 = arith.constant 0 : i32
    %c0_i32_1 = arith.constant 0 : i32
    %c0_i32_2 = arith.constant 0 : i32
    return %arg1, %c0_i32, %c0_i32_0, %c0_i32_1 : i32, i32, i32, i32
  }
  func.func @transform_4(%arg0: i32, %arg1: i32, %arg2: memref<4xi32, #tpu.memory_space<smem>>) -> (i32, i32, i32) {
    %c0_i32 = arith.constant 0 : i32
    %c0_i32_0 = arith.constant 0 : i32
    %c0_i32_1 = arith.constant 0 : i32
    return %arg1, %c0_i32, %c0_i32_0 : i32, i32, i32
  }
  func.func @transform_5(%arg0: i32, %arg1: i32, %arg2: memref<4xi32, #tpu.memory_space<smem>>) -> (i32, i32, i32) {
    %c0_i32 = arith.constant 0 : i32
    %c0_i32_0 = arith.constant 0 : i32
    %c0_i32_1 = arith.constant 0 : i32
    return %arg1, %c0_i32, %c0_i32_0 : i32, i32, i32
  }
  func.func @transform_6(%arg0: i32, %arg1: i32, %arg2: memref<4xi32, #tpu.memory_space<smem>>) -> (i32, i32, i32) {
    %c0_i32 = arith.constant 0 : i32
    %c0_i32_0 = arith.constant 0 : i32
    %c0_i32_1 = arith.constant 0 : i32
    return %arg1, %c0_i32, %c0_i32_0 : i32, i32, i32
  }
  func.func @transform_7(%arg0: i32, %arg1: i32, %arg2: memref<4xi32, #tpu.memory_space<smem>>) -> (i32, i32, i32) {
    %c0_i32 = arith.constant 0 : i32
    %c0_i32_0 = arith.constant 0 : i32
    %c0_i32_1 = arith.constant 0 : i32
    return %arg1, %c0_i32, %c0_i32_0 : i32, i32, i32
  }
  func.func @transform_8(%arg0: i32, %arg1: i32, %arg2: memref<4xi32, #tpu.memory_space<smem>>) -> (i32, i32) {
    %c0_i32 = arith.constant 0 : i32
    %c0_i32_0 = arith.constant 0 : i32
    %c0_i32_1 = arith.constant 0 : i32
    return %c0_i32, %c0_i32_0 : i32, i32
  }
  func.func @transform_9(%arg0: i32, %arg1: i32, %arg2: memref<4xi32, #tpu.memory_space<smem>>) -> (i32, i32) {
    %c0_i32 = arith.constant 0 : i32
    %c0_i32_0 = arith.constant 0 : i32
    %c0_i32_1 = arith.constant 0 : i32
    return %c0_i32, %c0_i32_0 : i32, i32
  }
  func.func @transform_10(%arg0: i32, %arg1: i32, %arg2: memref<4xi32, #tpu.memory_space<smem>>) -> (i32, i32) {
    %c0_i32 = arith.constant 0 : i32
    %c0_i32_0 = arith.constant 0 : i32
    %c0_i32_1 = arith.constant 0 : i32
    return %c0_i32, %c0_i32_0 : i32, i32
  }
  func.func @transform_11(%arg0: i32, %arg1: i32, %arg2: memref<4xi32, #tpu.memory_space<smem>>) -> (i32, i32, i32) {
    %c0_i32 = arith.constant 0 : i32
    %c0_i32_0 = arith.constant 0 : i32
    %c0_i32_1 = arith.constant 0 : i32
    return %arg0, %c0_i32, %c0_i32_0 : i32, i32, i32
  }
  func.func @transform_12(%arg0: i32, %arg1: i32, %arg2: memref<4xi32, #tpu.memory_space<smem>>) -> (i32, i32, i32) {
    %c0_i32 = arith.constant 0 : i32
    %c0_i32_0 = arith.constant 0 : i32
    %c0_i32_1 = arith.constant 0 : i32
    return %arg0, %c0_i32, %c0_i32_0 : i32, i32, i32
  }
}

</mosaic_0001>

<bundles_post_ra>
// kernel: sd_clip_forward.1
= control target key start
LH: loop header
LB: loop body
LE: loop exit
PB: predicated region body
PF: predicated region fallthrough
CT: control target
= control target key end

     0   :  { %s5184_s0 = inlined_call_operand.hbm [shape: s32[4], index: 0, kind: input, shape index: {}]   ;;  %s5185_s1 = inlined_call_operand.hbm [shape: f32[4,8,32], index: 1, kind: input, shape index: {}]   ;;  %s5186_s2 = inlined_call_operand.hbm [shape: bf16[2,6,32,16], index: 2, kind: input, shape index: {}]   ;;  %s5187_s3 = inlined_call_operand.hbm [shape: f32[2,6,16], index: 3, kind: input, shape index: {}]   ;;  %s5188_s4 = inlined_call_operand.hbm [shape: bf16[2,2,16,32], index: 4, kind: input, shape index: {}]   ;;  %s5189_s5 = inlined_call_operand.hbm [shape: bf16[2,32,128], index: 5, kind: input, shape index: {}]   ;;  %s5190_s6 = inlined_call_operand.hbm [shape: f32[2,1,128], index: 6, kind: input, shape index: {}]   ;;  %s5191_s7 = inlined_call_operand.hbm [shape: bf16[2,128,32], index: 7, kind: input, shape index: {}]   ;;  %s5192_s8 = inlined_call_operand.hbm [shape: f32[2,8,32], index: 8, kind: input, shape index: {}]   ;;  %s5193_s9 = inlined_call_operand.hbm [shape: f32[2,32], index: 9, kind: input, shape index: {}]   ;;  %s5194_s10 = inlined_call_operand.hbm [shape: bf16[32,32], index: 10, kind: input, shape index: {}]   ;;  %s5195_s11 = inlined_call_operand.hbm [shape: f32[8,8], index: 11, kind: input, shape index: {}]   ;;  %s5196_s12 = inlined_call_operand.hbm [shape: f32[4,8,32], index: 12, kind: output, shape index: {0}]   ;;  %s5197_s13 = inlined_call_operand.hbm [shape: f32[4,1,32], index: 13, kind: output, shape index: {1}]  }
   0x1   :  { %5242 = sst [smem:[#allocation51_spill]] %s5185_s1  ;;  %s3543_s27 = scalar_lea.hbm %s5184_s0, 16 }
   0x2   :  { %5243 = sst [smem:[#allocation52_spill]] %s5186_s2  ;;  %p3544_p0 = scmp.ne.s32.totalorder %s5184_s0, %s3543_s27 }
   0x3   :  { %5244 = sst [smem:[#allocation53_spill]] %s5187_s3  ;;  %p3547_p1 = scmp.lt.u32.totalorder %s3543_s27, %s5184_s0 }
   0x4   :  { %5245 = sst [smem:[#allocation54_spill]] %s5188_s4 }
   0x5   :  { %5246 = sst [smem:[#allocation55_spill]] %s5190_s6  ;;  %p3549_p2 = pnand %p3547_p1, %p3544_p0 }
   0x6   :  { %5247 = sst [smem:[#allocation56_spill]] %s5191_s7 }
   0x7   :  { %5248 = sst [smem:[#allocation57_spill]] %s5192_s8 }
   0x8   :  { %5249 = sst [smem:[#allocation58_spill]] %s5193_s9 }
   0x9   :  { %5250 = sst [smem:[#allocation59_spill]] %s5194_s10 }
   0xa   :  { %5251 = sst [smem:[#allocation60_spill]] %s5195_s11 }
   0xb   :  { %5252 = sst [smem:[#allocation61_spill]] %s5196_s12 }
   0xc   :  { %5253 = sst [smem:[#allocation62_spill]] %s5197_s13 }
   0xd   :  { %3552 = shalt.err (!%p3549_p2)  }
   0xe   :  { %s4059_s15 = smov [#allocation4]  }
   0xf   :  { %20 = dma.hbm_to_smem %s5184_s0, 16, %s4059_s15, [#allocation3] }
  0x10   :  { %3977 = dma.done.wait [#allocation3], 16 }
  0x11   :  { %3978 = vsyncadd [#allocation3], 4294967280 }
  0x12   :  { %22 = sfence }
  0x13   :  { %23 = vsyncpa [#allocation6], 0 }
  0x14   :  { %25 = vsyncpa [#allocation6 + $0x1], 0 }
  0x15   :  { %26 = vsyncpa [#allocation9], 0 }
  0x16   :  { %28 = vsyncpa [#allocation9 + $0x1], 0 }
  0x17   :  { %29 = vsyncpa [#allocation12], 0 }
  0x18   :  { %31 = vsyncpa [#allocation12 + $0x1], 0 }
  0x19   :  { %32 = vsyncpa [#allocation15], 0 }
  0x1a   :  { %34 = vsyncpa [#allocation15 + $0x1], 0 }
  0x1b   :  { %35 = vsyncpa [#allocation18], 0 }
  0x1c   :  { %37 = vsyncpa [#allocation18 + $0x1], 0 }
  0x1d   :  { %38 = vsyncpa [#allocation21], 0 }
  0x1e   :  { %39 = vsyncpa [#allocation7], 0 }
  0x1f   :  { %41 = vsyncpa [#allocation7 + $0x1], 0 }
  0x20   :  { %42 = vsyncpa [#allocation25], 0 }
  0x21   :  { %44 = vsyncpa [#allocation25 + $0x1], 0  ;;  %s4168_s18 = smov 0   ;;  %s4170_s0 = smov 0  }
  0x22   :  { %s4172_s19 = smov 0   ;;  %s4174_s20 = smov 0  }
  0x23   :  { %s4176_s21 = smov 0   ;;  %s4178_s22 = smov 0  }
  0x24   :  { %s4180_s23 = smov 0   ;;  %s4182_s24 = smov 0  }
  0x25   :  { %s4184_s25 = smov 0   ;;  %s4186_s26 = smov 0  }
  0x26   :  { %s4188_s27 = smov 0  }
  0x27 LB: > { %5254 = sst [smem:[#allocation36_spill]] %s4021_s0  ;;  %s4222_s28 = sadd.s32 4294967295, %s4057_s27   ;;  %s4057_s27 = sphi %s4188_s27, %s50_s27   ;;  %s4053_s26 = sphi %s4186_s26, %s5336_s26   ;;  %s4049_s25 = sphi %s4184_s25, %s5341_s25   ;;  %s4045_s24 = sphi %s4182_s24, %s5334_s24   ;;  %s4041_s23 = sphi %s4180_s23, %s5340_s23   ;;  %s4037_s22 = sphi %s4178_s22, %s5333_s22   ;;  %s4033_s21 = sphi %s4176_s21, %s5339_s21   ;;  %s4029_s20 = sphi %s4174_s20, %s5338_s20   ;;  %s4025_s19 = sphi %s4172_s19, %s5337_s19   ;;  %s4021_s0 = sphi %s4170_s0, %s5331_s0   ;;  %s4017_s18 = sphi %s4168_s18, %s5330_s18  }
  0x28   : > { %5255 = sst [smem:[#allocation37_spill]] %s4025_s19  ;;  %s2885_s29 = sadd.s32 4294967294, %s4057_s27  }
  0x29   : > { %5256 = sst [smem:[#allocation38_spill]] %s4029_s20  ;;  %p82_p3 = scmp.ne.s32.totalorder %s4033_s21, %s4029_s20 }
  0x2a   : > { %5257 = sst [smem:[#allocation39_spill]] %s4037_s22  ;;  %p5207_p4 = scmp.eq.s32.totalorder %s4222_s28, 0 }
  0x2b   : > { %5258 = sst [smem:[#allocation40_spill]] %s4041_s23  ;;  %p108_p5 = scmp.ne.s32.totalorder %s4021_s0, %s4017_s18 }
  0x2c   : > { %5259 = sst [smem:[#allocation41_spill]] %s4045_s24  ;;  %p4232_p7 = por %p5207_p4, %p82_p3 }
  0x2d   : > { %5260 = sst [smem:[#allocation42_spill]] %s4053_s26  ;;  %p357_p8 = scmp.eq.s32.totalorder %s2885_s29, 3 }
  0x2e   : > { %5261 = sst [smem:[#allocation43_spill]] %s4222_s28  ;;  %p4238_p9 = por %p108_p5, %p5207_p4 }
  0x2f   : > { %s5262_s30 = scalar_select %p4232_p7, 1, 0 }
  0x30   : > { %s5264_s14 = scalar_select %p4238_p9, 1, 0 }
  0x31   : > { %5263 = sst [smem:[#allocation44_spill]] %s5262_s30  ;;  %p2886_p10 = scmp.ge.s32.totalorder %s4057_s27, 1 }
  0x32   : > { %5265 = sst [smem:[#allocation45_spill]] %s5264_s14  ;;  %p4243_p11 = por %p357_p8, %p82_p3 }
  0x33   : > { %p390_p12 = scmp.lt.s32.totalorder %s4057_s27, 5  ;;  %s4060_s17 = smov [#allocation19]  }
  0x34   : > { %s5266_s15 = scalar_select %p4243_p11, 1, 0 }
  0x35   : > { %p4248_p13 = pnand %p2886_p10, %p390_p12  ;;  %s403_s18 = sshll.u32 %s4060_s17, 4  ;;  %s404_s18 = int_to_ptr.vmem [resolvable:$true] %s403_s18 }
  0x36   : > { %5267 = sst [smem:[#allocation46_spill]] %s5266_s15  ;;  %s4061_s29 = smov [#allocation20]  }
  0x37   : > { %s5268_s16 = scalar_select %p4248_p13, 1, 0 }
  0x38   : > { %p3321_p0 = pneg %p4248_p13  ;;  %s413_s20 = sshll.u32 %s4061_s29, 4  ;;  %s4260_s20 = int_to_ptr.vmem [resolvable:$true] %s413_s20 }
  0x39   : > { %5269 = sst [smem:[#allocation47_spill]] %s5268_s16  ;;  %s5271_s9 = sld [smem:[#allocation58_spill]] }
  0x3a   : > { %p4256_p1 = pnand %p3321_p0, %p5207_p4 }
  0x3c   : > { %s5270_s13 = scalar_select %p4256_p1, 1, 0 }
  0x3d   : > { %p4270_p3 = pneg %p4256_p1 }
  0x3f   : > { %s3553_s24 = scalar_lea.hbm %s5271_s9, 32 }
  0x40   : > { %p3554_p2 = scmp.ne.s32.totalorder %s5271_s9, %s3553_s24  ;;  %p3560_p10 = scmp.lt.u32.totalorder %s3553_s24, %s5271_s9 }
  0x41   : > { %s5272_s17 = scalar_select %p4270_p3, 1, 0 }
  0x42   : > { %p3556_p5 = pnand %p4270_p3, %p3554_p2 }
  0x44   : > { %p3557_p8 = pneg %p3556_p5 }
  0x46   : > { %p3562_p12 = pnand %p3560_p10, %p3557_p8 }
  0x48   : > { %3565 = shalt.err (!%p3562_p12)
}
  0x49   : > { %s3566_s12 = scalar_lea.vmem %s404_s18, 32  ;;  %p3574_p11 = scmp.lt.s32.totalorder %s404_s18, %s404_s18 }
  0x4a   : > { %p3567_p0 = scmp.ne.s32.totalorder %s404_s18, %s3566_s12  ;;  %p3575_p9 = scmp.lt.s32.totalorder %s3566_s12, %s3566_s12 }
  0x4c   : > { %p3569_p4 = pnand %p3567_p0, %p4270_p3  ;;  %p3576_p7 = por %p3575_p9, %p3574_p11 }
  0x4e   : > { %p3570_p6 = pneg %p3569_p4 }
  0x50   : > { %p3577_p13 = pnand %p3576_p7, %p3570_p6 }
  0x52   : > { %3580 = shalt.err (!%p3577_p13)
}
  0x53   : > { %3324 = dma.hbm_to_vmem [thread:$0]  (!%p4256_p1), %s5271_s9, 32, %s404_s18, [#allocation18]  }
  0x54   : > { %s5273_s10 = sld [smem:[#allocation59_spill]] }
  0x5a   : > { %s3581_s15 = scalar_lea.hbm %s5273_s10, 256 }
  0x5b   : > { %p3582_p4 = scmp.ne.s32.totalorder %s5273_s10, %s3581_s15  ;;  %p3588_p6 = scmp.lt.u32.totalorder %s3581_s15, %s5273_s10 }
  0x5d   : > { %p3584_p2 = pnand %p3582_p4, %p4270_p3 }
  0x5f   : > { %p3585_p9 = pneg %p3584_p2 }
  0x61   : > { %p3590_p7 = pnand %p3588_p6, %p3585_p9 }
  0x63   : > { %3593 = shalt.err (!%p3590_p7)
}
  0x64   : > { %s3594_s18 = scalar_lea.vmem %s4260_s20, 256  ;;  %p3602_p8 = scmp.lt.s32.totalorder %s4260_s20, %s4260_s20 }
  0x65   : > { %p3595_p11 = scmp.ne.s32.totalorder %s4260_s20, %s3594_s18  ;;  %p3603_p10 = scmp.lt.s32.totalorder %s3594_s18, %s3594_s18 }
  0x67   : > { %p3597_p13 = pnand %p3595_p11, %p4270_p3  ;;  %p3604_p12 = por %p3603_p10, %p3602_p8 }
  0x69   : > { %p3598_p5 = pneg %p3597_p13 }
  0x6b   : > { %p3605_p0 = pnand %p3604_p12, %p3598_p5 }
  0x6d   : > { %3608 = shalt.err (!%p3605_p0)
}
  0x6e   : > { %s5213_s16 = smov 64   ;;  %s5215_s8 = smov 4  }
  0x6f   : > { %3327 = dma.hbm_to_vmem [thread:$0]  (!%p4256_p1), %s5273_s10, 256, %s4260_s20, [#allocation21], %s5213_s16, %s5213_s16, %s5215_s8  }
  0x70   : > { %p5219_p4 = scmp.eq.s32.totalorder %s4057_s27, 0  ;;  %p102_p2 = scmp.ne.s32.totalorder %s4025_s19, %s4021_s0 }
  0x71   : > { %p5218_p9 = scmp.lt.s32.totalorder %s4057_s27, 4  ;;  %s4318_s30 = sand.u32 1, %s4057_s27  }
  0x72   : > { %s4321_s15 = sand.u32 1, %s4025_s19   ;;  %p104_p6 = por %p102_p2, %p5219_p4 }
  0x73   : > { %s3286_s29 = smul.u32 96, %s4321_s15  ;;  %s5275_s2 = sld [smem:[#allocation52_spill]] }
  0x74   : > { %s3287_s12 = smul.u32 1536, %s4049_s25  ;;  %p4329_p7 = pnand %p5218_p9, %p104_p6 }
  0x75   : > { %s463_s16 = scalar_lea.vmem [#allocation8], %s3286_s29  ;;  %s5226_s9 = scalar_lea.sflag [#allocation9], %s4318_s30 }
  0x76   : > { %s5274_s18 = scalar_select %p4329_p7, 1, 0 }
  0x77   : > { %s470_s8 = sshll.u32 %s463_s16, 4  ;;  %p4346_p13 = pneg %p4329_p7  ;;  %s4339_s8 = int_to_ptr.vmem [resolvable:$true] %s470_s8 }
  0x79   : > { %s4337_s24 = scalar_lea.hbm %s5275_s2, %s3287_s12  ;;  %s3614_s14 = scalar_lea.hbm %s5275_s2, 3072 }
  0x7a   : > { %s3609_s10 = scalar_lea.hbm %s4337_s24, 1536  ;;  %p3615_p10 = scmp.lt.u32.totalorder %s4337_s24, %s5275_s2 }
  0x7b   : > { %p3610_p11 = scmp.ne.s32.totalorder %s4337_s24, %s3609_s10  ;;  %p3616_p12 = scmp.lt.u32.totalorder %s3614_s14, %s3609_s10 }
  0x7c   : > { %p3618_p2 = scmp.lt.u32.totalorder %s3609_s10, %s4337_s24 }
  0x7d   : > { %p3612_p5 = pnand %p4346_p13, %p3610_p11  ;;  %p3617_p0 = por %p3616_p12, %p3615_p10 }
  0x7f   : > { %p3613_p8 = pneg %p3612_p5  ;;  %p3619_p6 = por %p3618_p2, %p3617_p0 }
  0x81   : > { %p3620_p9 = pnand %p3619_p6, %p3613_p8 }
  0x83   : > { %3623 = shalt.err (!%p3620_p9)
}
  0x84   : > { %s3624_s20 = scalar_lea.vmem %s4339_s8, 1536  ;;  %s4064_s12 = smov [#allocation8]  }
  0x85   : > { %p3625_p11 = scmp.ne.s32.totalorder %s4339_s8, %s3624_s20  ;;  %s3629_s23 = sshll.u32 %s4064_s12, 4  ;;  %s3630_s23 = int_to_ptr.vmem [resolvable:$false] %s3629_s23 }
  0x86   : > { %s3631_s29 = scalar_lea.vmem %s3630_s23, 3072  ;;  %p3632_p1 = scmp.lt.s32.totalorder %s4339_s8, %s3630_s23 }
  0x87   : > { %p3627_p5 = pnand %p3625_p11, %p4346_p13  ;;  %p3633_p3 = scmp.lt.s32.totalorder %s3631_s29, %s3624_s20 }
  0x89   : > { %p3628_p4 = pneg %p3627_p5  ;;  %p3634_p10 = por %p3633_p3, %p3632_p1 }
  0x8b   : > { %p3635_p12 = pnand %p3634_p10, %p3628_p4 }
  0x8d   : > { %3638 = shalt.err (!%p3635_p12)
}
  0x8e   : > { %s5277_s10 = smov 4   ;;  %s5278_s14 = smov 64  }
  0x8f   : > { %3337 = dma.hbm_to_vmem [thread:$0]  (!%p4329_p7), %s4337_s24, 1536, %s4339_s8, %s5226_s9, %s5278_s14, %s5278_s14, %s5277_s10  }
  0x90   : > { %s2991_s16 = sshll.u32 %s4049_s25, 8  ;;  %s5279_s4 = sld [smem:[#allocation54_spill]] }
  0x91   : > { %s5280_s29 = sshll.u32 %s4321_s15, 4  ;;  %s5229_s3 = scalar_lea.sflag [#allocation12], %s4318_s30 }
  0x92   : > { %s502_s2 = scalar_lea.vmem [#allocation11], %s5280_s29 }
  0x93   : > { %s509_s7 = sshll.u32 %s502_s2, 4  ;;  %s4384_s7 = int_to_ptr.vmem [resolvable:$true] %s509_s7 }
  0x96   : > { %s4380_s23 = scalar_lea.hbm %s5279_s4, %s2991_s16  ;;  %s3644_s20 = scalar_lea.hbm %s5279_s4, 512 }
  0x97   : > { %s3639_s1 = scalar_lea.hbm %s4380_s23, 256  ;;  %p3645_p9 = scmp.lt.u32.totalorder %s4380_s23, %s5279_s4 }
  0x98   : > { %p3640_p1 = scmp.ne.s32.totalorder %s4380_s23, %s3639_s1  ;;  %p3646_p8 = scmp.lt.u32.totalorder %s3644_s20, %s3639_s1 }
  0x99   : > { %p3648_p2 = scmp.lt.u32.totalorder %s3639_s1, %s4380_s23 }
  0x9a   : > { %p3642_p3 = pnand %p3640_p1, %p4346_p13  ;;  %p3647_p0 = por %p3646_p8, %p3645_p9 }
  0x9c   : > { %p3643_p4 = pneg %p3642_p3  ;;  %p3649_p6 = por %p3648_p2, %p3647_p0 }
  0x9e   : > { %p3650_p11 = pnand %p3649_p6, %p3643_p4 }
  0xa0   : > { %3653 = shalt.err (!%p3650_p11)
}
  0xa1   : > { %s3654_s2 = scalar_lea.vmem %s4384_s7, 256  ;;  %s4065_s29 = smov [#allocation11]  }
  0xa2   : > { %p3655_p5 = scmp.ne.s32.totalorder %s4384_s7, %s3654_s2  ;;  %s3659_s8 = sshll.u32 %s4065_s29, 4  ;;  %s3660_s8 = int_to_ptr.vmem [resolvable:$false] %s3659_s8 }
  0xa3   : > { %s3661_s9 = scalar_lea.vmem %s3660_s8, 512  ;;  %p3662_p1 = scmp.lt.s32.totalorder %s4384_s7, %s3660_s8 }
  0xa4   : > { %p3657_p10 = pnand %p3655_p5, %p4346_p13  ;;  %p3663_p3 = scmp.lt.s32.totalorder %s3661_s9, %s3654_s2 }
  0xa6   : > { %p3658_p12 = pneg %p3657_p10  ;;  %p3664_p9 = por %p3663_p3, %p3662_p1 }
  0xa8   : > { %p3665_p8 = pnand %p3664_p9, %p3658_p12 }
  0xaa   : > { %3668 = shalt.err (!%p3665_p8)
}
  0xab   : > { %3343 = dma.hbm_to_vmem [thread:$0]  (!%p4329_p7), %s4380_s23, 256, %s4384_s7, %s5229_s3, %s5278_s14, %s5278_s14, %s5277_s10  }
  0xac   : > { %s4418_s20 = scalar_lea.hbm %s5189_s5, %s2991_s16  ;;  %s5281_s12 = sshll.u32 %s4321_s15, 4 }
  0xad   : > { %s523_s2 = scalar_lea.vmem [#allocation13], %s5281_s12  ;;  %s2903_s8 = sshll.u32 %s4049_s25, 4 }
  0xae   : > { %s530_s29 = sshll.u32 %s523_s2, 4  ;;  %s5282_s6 = sld [smem:[#allocation55_spill]]  ;;  %s4422_s29 = int_to_ptr.vmem [resolvable:$true] %s530_s29 }
  0xaf   : > { %s543_s7 = scalar_lea.vmem [#allocation14], %s4321_s15  ;;  %s5232_s16 = scalar_lea.sflag [#allocation15], %s4318_s30 }
  0xb0   : > { %s550_s23 = sshll.u32 %s543_s7, 4  ;;  %s551_s23 = int_to_ptr.vmem [resolvable:$true] %s550_s23 }
  0xb4   : > { %s4428_s19 = scalar_lea.hbm %s5282_s6, %s2903_s8  ;;  %s3674_s2 = scalar_lea.hbm %s5282_s6, 32 }
  0xb5   : > { %s3669_s1 = scalar_lea.hbm %s4428_s19, 16  ;;  %p3675_p6 = scmp.lt.u32.totalorder %s4428_s19, %s5282_s6 }
  0xb6   : > { %p3670_p4 = scmp.ne.s32.totalorder %s4428_s19, %s3669_s1  ;;  %p3676_p11 = scmp.lt.u32.totalorder %s3674_s2, %s3669_s1 }
  0xb7   : > { %p3678_p10 = scmp.lt.u32.totalorder %s3669_s1, %s4428_s19 }
  0xb8   : > { %p3672_p0 = pnand %p3670_p4, %p4346_p13  ;;  %p3677_p5 = por %p3676_p11, %p3675_p6 }
  0xba   : > { %p3673_p2 = pneg %p3672_p0  ;;  %p3679_p12 = por %p3678_p10, %p3677_p5 }
  0xbc   : > { %p3680_p1 = pnand %p3679_p12, %p3673_p2 }
  0xbe   : > { %3683 = shalt.err (!%p3680_p1)
}
  0xbf   : > { %s3684_s9 = scalar_lea.vmem %s551_s23, 16  ;;  %s4066_s7 = smov [#allocation14]  }
  0xc0   : > { %p3685_p3 = scmp.ne.s32.totalorder %s551_s23, %s3684_s9  ;;  %s3689_s3 = sshll.u32 %s4066_s7, 4  ;;  %s3690_s3 = int_to_ptr.vmem [resolvable:$false] %s3689_s3 }
  0xc1   : > { %s3691_s24 = scalar_lea.vmem %s3690_s3, 32  ;;  %p3692_p4 = scmp.lt.s32.totalorder %s551_s23, %s3690_s3 }
  0xc2   : > { %p3687_p9 = pnand %p3685_p3, %p4346_p13  ;;  %p3693_p0 = scmp.lt.s32.totalorder %s3691_s24, %s3684_s9 }
  0xc4   : > { %p3688_p8 = pneg %p3687_p9  ;;  %p3694_p7 = por %p3693_p0, %p3692_p4 }
  0xc6   : > { %p3695_p6 = pnand %p3694_p7, %p3688_p8 }
  0xc8   : > { %3698 = shalt.err (!%p3695_p6)
}
  0xc9   : > { %p5283_p11 = scmp.ne.s32.totalorder %s5274_s18, 0  ;;  %s4067_s1 = smov [#allocation22]  }
  0xca   : > { %s427_s12 = sshll.u32 %s4067_s1, 4  ;;  %s5284_s11 = sld [smem:[#allocation60_spill]]  ;;  %s428_s12 = int_to_ptr.vmem [resolvable:$true] %s427_s12 }
  0xcb   : > { %3349 = dma.hbm_to_vmem [thread:$0]  (!%p5283_p11), %s4428_s19, 16, %s551_s23, %s5232_s16  }
  0xcc   : > { %p5285_p7 = scmp.ne.s32.totalorder %s5272_s17, 0 }
  0xd0   : > { %s3699_s8 = scalar_lea.hbm %s5284_s11, 128 }
  0xd1   : > { %p3700_p2 = scmp.ne.s32.totalorder %s5284_s11, %s3699_s8  ;;  %p3706_p12 = scmp.lt.u32.totalorder %s3699_s8, %s5284_s11 }
  0xd3   : > { %p3702_p5 = pnand %p3700_p2, %p5285_p7 }
  0xd5   : > { %p3703_p10 = pneg %p3702_p5 }
  0xd7   : > { %p3708_p1 = pnand %p3706_p12, %p3703_p10 }
  0xd9   : > { %3711 = shalt.err (!%p3708_p1)
}
  0xda   : > { %s3712_s19 = scalar_lea.vmem %s428_s12, 128  ;;  %p3720_p4 = scmp.lt.s32.totalorder %s428_s12, %s428_s12 }
  0xdb   : > { %p3713_p3 = scmp.ne.s32.totalorder %s428_s12, %s3712_s19  ;;  %p3721_p0 = scmp.lt.s32.totalorder %s3712_s19, %s3712_s19 }
  0xdd   : > { %p3715_p9 = pnand %p3713_p3, %p5285_p7  ;;  %p3722_p6 = por %p3721_p0, %p3720_p4 }
  0xdf   : > { %p3716_p8 = pneg %p3715_p9 }
  0xe1   : > { %p3723_p11 = pnand %p3722_p6, %p3716_p8 }
  0xe3   : > { %3726 = shalt.err (!%p3723_p11)
}
  0xe4   : > { %p5286_p2 = scmp.ne.s32.totalorder %s5270_s13, 0  ;;  %s5287_s17 = sld [smem:[#allocation37_spill]] }
  0xe5   : > { %s59_s2 = sadd.s32 1, %s4049_s25  ;;  %s62_s4 = sadd.s32 1, %s4053_s26 }
  0xe6   : > { %3330 = dma.hbm_to_vmem [thread:$0]  (!%p5286_p2), %s5284_s11, 128, %s428_s12, [#allocation21]  }
  0xe7   : > { %p60_p11 = scmp.ge.s32.totalorder %s59_s2, 2  ;;  %s69_s13 = sadd.s32 1, %s4037_s22 }
  0xe8   : > { %p76_p7 = scmp.ne.s32.totalorder %s4037_s22, %s4033_s21  ;;  %s438_s8 = sand.u32 1, %s4037_s22  }
  0xe9   : > { %s5343_s2 = smov (%p60_p11, %s59_s2), 0  ;;  %s5345_s4 = smov (!%p60_p11, %s62_s4), %s4053_s26 }
  0xea   : > { %5288 = sst [smem:[#allocation48_spill]] %s5343_s2  ;;  %p5289_p5 = scmp.eq.s32.totalorder %s4057_s27, 0 }
  0xeb   : > { %s92_s12 = ssub.s32 %s4049_s25, %s5343_s2  ;;  %p64_p12 = scmp.ge.s32.totalorder %s5345_s4, 2 }
  0xec   : > { %p4480_p10 = por %p5289_p5, %p76_p7  ;;  %p93_p1 = scmp.eq.s32.totalorder %s92_s12, 0 }
  0xed   : > { %p5291_p3 = scmp.eq.s32.totalorder %s4222_s28, 3  ;;  %s5347_s4 = smov (%p64_p12, %s5345_s4), 0 }
  0xee   : > { %5293 = sst [smem:[#allocation49_spill]] %s5347_s4  ;;  %s5294_s9 = sadd.s32 1, %s5287_s17 }
  0xef   : > { %p4488_p9 = por %p5291_p3, %p76_p7  ;;  %s5349_s17 = smov (!%p93_p1, %s5287_s17), %s5294_s9 }
  0xf0   : > { %s66_s24 = ssub.s32 %s4053_s26, %s5347_s4  ;;  %s2891_s19 = sshll.u32 %s438_s8, 4 }
  0xf1   : > { %s5292_s3 = scalar_select %p4488_p9, 1, 0 }
  0xf2   : > { %p67_p8 = scmp.eq.s32.totalorder %s66_s24, 0  ;;  %s2990_s23 = sshll.u32 %s4053_s26, 8 }
  0xf3   : > { %s442_s1 = scalar_lea.vmem [#allocation5], %s2891_s19  ;;  %s5296_s2 = sld [smem:[#allocation51_spill]] }
  0xf4   : > { %s449_s16 = sshll.u32 %s442_s1, 4  ;;  %p5297_p4 = scmp.lt.s32.totalorder %s4057_s27, 4  ;;  %s4510_s16 = int_to_ptr.vmem [resolvable:$true] %s449_s16 }
  0xf5   : > { %s4503_s6 = scalar_select %p67_p8, %s4037_s22, %s69_s13  }
  0xf6   : > { %p4516_p0 = pnand %p5297_p4, %p4480_p10  ;;  %s2895_s13 = sshll.u32 %s4321_s15, 3 }
  0xf7   : > { %5295 = sst [smem:[#allocation50_spill]] %s4503_s6  ;;  %s4521_s24 = scalar_lea.sflag [#allocation6], %s438_s8 }
  0xf8   : > { %p3729_p2 = pneg %p4516_p0 }
  0xf9   : > { %s4508_s28 = scalar_lea.hbm %s5296_s2, %s2990_s23  ;;  %s3732_s23 = scalar_lea.hbm %s5296_s2, 512 }
  0xfa   : > { %s3727_s11 = scalar_lea.hbm %s4508_s28, 256  ;;  %p3733_p5 = scmp.lt.u32.totalorder %s4508_s28, %s5296_s2 }
  0xfb   : > { %p3728_p6 = scmp.ne.s32.totalorder %s4508_s28, %s3727_s11  ;;  %p3734_p10 = scmp.lt.u32.totalorder %s3732_s23, %s3727_s11 }
  0xfc   : > { %p3736_p1 = scmp.lt.u32.totalorder %s3727_s11, %s4508_s28 }
  0xfd   : > { %p3730_p11 = pnand %p3729_p2, %p3728_p6  ;;  %p3735_p12 = por %p3734_p10, %p3733_p5 }
  0xff   : > { %p3731_p7 = pneg %p3730_p11  ;;  %p3737_p3 = por %p3736_p1, %p3735_p12 }
 0x101   : > { %p3738_p8 = pnand %p3737_p3, %p3731_p7 }
 0x103   : > { %3741 = shalt.err (!%p3738_p8)
}
 0x104   : > { %s3742_s8 = scalar_lea.vmem %s4510_s16, 256  ;;  %s4068_s19 = smov [#allocation5]  }
 0x105   : > { %p3743_p4 = scmp.ne.s32.totalorder %s4510_s16, %s3742_s8  ;;  %s3747_s7 = sshll.u32 %s4068_s19, 4  ;;  %s3748_s7 = int_to_ptr.vmem [resolvable:$false] %s3747_s7 }
 0x106   : > { %s3749_s1 = scalar_lea.vmem %s3748_s7, 512  ;;  %p3750_p9 = scmp.lt.s32.totalorder %s4510_s16, %s3748_s7 }
 0x107   : > { %p3745_p6 = pnand %p3743_p4, %p3729_p2  ;;  %p3751_p5 = scmp.lt.s32.totalorder %s3749_s1, %s3742_s8 }
 0x109   : > { %p3746_p11 = pneg %p3745_p6  ;;  %p3752_p10 = por %p3751_p5, %p3750_p9 }
 0x10b   : > { %p3753_p12 = pnand %p3752_p10, %p3746_p11 }
 0x10d   : > { %3756 = shalt.err (!%p3753_p12)
}
 0x10e   : > { %s4069_s11 = smov 128   ;;  %s4070_s23 = smov 8  }
 0x10f   : > { %3334 = dma.hbm_to_vmem [thread:$0]  (!%p4516_p0), %s4508_s28, 256, %s4510_s16, %s4521_s24, %s4069_s11, %s4069_s11, %s4070_s23  }
 0x110   : > { %s2896_s12 = sshll.u32 %s4049_s25, 7  ;;  %s484_s19 = scalar_lea.vmem [#allocation10], %s2895_s13 }
 0x111   : > { %s491_s7 = sshll.u32 %s484_s19, 4  ;;  %s5299_s2 = sld [smem:[#allocation53_spill]]  ;;  %s492_s7 = int_to_ptr.vmem [resolvable:$true] %s491_s7 }
 0x117   : > { %s489_s4 = scalar_lea.hbm %s5299_s2, %s2896_s12  ;;  %s3762_s9 = scalar_lea.hbm %s5299_s2, 256 }
 0x118   : > { %s3757_s26 = scalar_lea.hbm %s489_s4, 128  ;;  %p3763_p0 = scmp.lt.u32.totalorder %s489_s4, %s5299_s2 }
 0x119   : > { %p3758_p9 = scmp.ne.s32.totalorder %s489_s4, %s3757_s26  ;;  %p3764_p1 = scmp.lt.u32.totalorder %s3762_s9, %s3757_s26 }
 0x11a   : > { %p3766_p8 = scmp.lt.u32.totalorder %s3757_s26, %s489_s4 }
 0x11b   : > { %p3760_p2 = pnand %p3758_p9, %p4346_p13  ;;  %p3765_p3 = por %p3764_p1, %p3763_p0 }
 0x11d   : > { %p3761_p7 = pneg %p3760_p2  ;;  %p3767_p4 = por %p3766_p8, %p3765_p3 }
 0x11f   : > { %p3768_p6 = pnand %p3767_p4, %p3761_p7 }
 0x121   : > { %3771 = shalt.err (!%p3768_p6)
}
 0x122   : > { %s3772_s24 = scalar_lea.vmem %s492_s7, 128  ;;  %s4071_s11 = smov [#allocation10]  }
 0x123   : > { %p3773_p11 = scmp.ne.s32.totalorder %s492_s7, %s3772_s24  ;;  %s3777_s23 = sshll.u32 %s4071_s11, 4  ;;  %s3778_s23 = int_to_ptr.vmem [resolvable:$false] %s3777_s23 }
 0x124   : > { %s3779_s6 = scalar_lea.vmem %s3778_s23, 256  ;;  %p3780_p12 = scmp.lt.s32.totalorder %s492_s7, %s3778_s23 }
 0x125   : > { %p3775_p5 = pnand %p3773_p11, %p4346_p13  ;;  %p3781_p9 = scmp.lt.s32.totalorder %s3779_s6, %s3772_s24 }
 0x127   : > { %p3776_p10 = pneg %p3775_p5  ;;  %p3782_p2 = por %p3781_p9, %p3780_p12 }
 0x129   : > { %p3783_p0 = pnand %p3782_p2, %p3776_p10 }
 0x12b   : > { %3786 = shalt.err (!%p3783_p0)
}
 0x12c   : > { %p5300_p1 = scmp.ne.s32.totalorder %s5274_s18, 0  ;;  %s5301_s22 = scalar_lea.sflag [#allocation9], %s4318_s30 }
 0x12d   : > { %s3787_s26 = scalar_lea.hbm %s4418_s20, 256  ;;  %s3792_s1 = scalar_lea.hbm %s5189_s5, 512 }
 0x12e   : > { %3340 = dma.hbm_to_vmem [thread:$0]  (!%p5300_p1), %s489_s4, 128, %s492_s7, %s5301_s22  }
 0x12f   : > { %p3788_p7 = scmp.ne.s32.totalorder %s4418_s20, %s3787_s26  ;;  %p3793_p4 = scmp.lt.u32.totalorder %s4418_s20, %s5189_s5 }
 0x130   : > { %p3794_p6 = scmp.lt.u32.totalorder %s3792_s1, %s3787_s26  ;;  %p3796_p5 = scmp.lt.u32.totalorder %s3787_s26, %s4418_s20 }
 0x131   : > { %p3790_p3 = pnand %p3788_p7, %p4346_p13 }
 0x132   : > { %p3795_p11 = por %p3794_p6, %p3793_p4 }
 0x133   : > { %p3791_p8 = pneg %p3790_p3 }
 0x134   : > { %p3797_p10 = por %p3796_p5, %p3795_p11 }
 0x136   : > { %p3798_p12 = pnand %p3797_p10, %p3791_p8 }
 0x138   : > { %3801 = shalt.err (!%p3798_p12)
}
 0x139   : > { %s3802_s4 = scalar_lea.vmem %s4422_s29, 256  ;;  %s4072_s7 = smov [#allocation13]  }
 0x13a   : > { %p3803_p9 = scmp.ne.s32.totalorder %s4422_s29, %s3802_s4  ;;  %s3807_s16 = sshll.u32 %s4072_s7, 4  ;;  %s3808_s16 = int_to_ptr.vmem [resolvable:$false] %s3807_s16 }
 0x13b   : > { %s3809_s24 = scalar_lea.vmem %s3808_s16, 512  ;;  %p3810_p7 = scmp.lt.s32.totalorder %s4422_s29, %s3808_s16 }
 0x13c   : > { %p3805_p2 = pnand %p3803_p9, %p4346_p13  ;;  %p3811_p3 = scmp.lt.s32.totalorder %s3809_s24, %s3802_s4 }
 0x13e   : > { %p3806_p0 = pneg %p3805_p2  ;;  %p3812_p4 = por %p3811_p3, %p3810_p7 }
 0x140   : > { %p3813_p6 = pnand %p3812_p4, %p3806_p0 }
 0x142   : > { %3816 = shalt.err (!%p3813_p6)
}
 0x143   : > { %s5302_s11 = scalar_lea.sflag [#allocation12], %s4318_s30  ;;  %s2904_s23 = sshll.u32 %s4321_s15, 6 }
 0x144   : > { %3346 = dma.hbm_to_vmem [thread:$0]  (!%p5300_p1), %s4418_s20, 256, %s4422_s29, %s5302_s11, %s5278_s14, %s5278_s14, %s5277_s10  }
 0x145   : > { %s2993_s6 = sshll.u32 %s4049_s25, 10  ;;  %s5303_s19 = sld [smem:[#allocation56_spill]] }
 0x146   : > { %s561_s9 = scalar_lea.vmem [#allocation16], %s2904_s23 }
 0x147   : > { %s568_s28 = sshll.u32 %s561_s9, 4  ;;  %s4604_s28 = int_to_ptr.vmem [resolvable:$true] %s568_s28 }
 0x14b   : > { %s5304_s8 = smov %s5303_s19  ;;  %s4602_s1 = scalar_lea.hbm %s5303_s19, %s2993_s6 }
 0x14c   : > { %s3817_s4 = scalar_lea.hbm %s4602_s1, 1024  ;;  %s3822_s7 = scalar_lea.hbm %s5304_s8, 2048 }
 0x14d   : > { %p3818_p8 = scmp.ne.s32.totalorder %s4602_s1, %s3817_s4  ;;  %p3823_p10 = scmp.lt.u32.totalorder %s4602_s1, %s5304_s8 }
 0x14e   : > { %p3824_p12 = scmp.lt.u32.totalorder %s3822_s7, %s3817_s4  ;;  %p3826_p2 = scmp.lt.u32.totalorder %s3817_s4, %s4602_s1 }
 0x14f   : > { %p3820_p11 = pnand %p3818_p8, %p4346_p13 }
 0x150   : > { %p3825_p9 = por %p3824_p12, %p3823_p10 }
 0x151   : > { %p3821_p5 = pneg %p3820_p11 }
 0x152   : > { %p3827_p0 = por %p3826_p2, %p3825_p9 }
 0x154   : > { %p3828_p7 = pnand %p3827_p0, %p3821_p5 }
 0x156   : > { %3831 = shalt.err (!%p3828_p7)
}
 0x157   : > { %s3832_s11 = scalar_lea.vmem %s4604_s28, 1024  ;;  %s4073_s23 = smov [#allocation16]  }
 0x158   : > { %p3833_p3 = scmp.ne.s32.totalorder %s4604_s28, %s3832_s11  ;;  %s3837_s6 = sshll.u32 %s4073_s23, 4  ;;  %s3838_s6 = int_to_ptr.vmem [resolvable:$false] %s3837_s6 }
 0x159   : > { %s3839_s22 = scalar_lea.vmem %s3838_s6, 2048  ;;  %p3840_p8 = scmp.lt.s32.totalorder %s4604_s28, %s3838_s6 }
 0x15a   : > { %p3835_p4 = pnand %p3833_p3, %p4346_p13  ;;  %p3841_p11 = scmp.lt.s32.totalorder %s3839_s22, %s3832_s11 }
 0x15c   : > { %p3836_p6 = pneg %p3835_p4  ;;  %p3842_p10 = por %p3841_p11, %p3840_p8 }
 0x15e   : > { %p3843_p12 = pnand %p3842_p10, %p3836_p6 }
 0x160   : > { %3846 = shalt.err (!%p3843_p12)
}
 0x161   : > { %s5305_s26 = scalar_lea.sflag [#allocation15], %s4318_s30  ;;  %s5306_s4 = sld [smem:[#allocation57_spill]] }
 0x162   : > { %3352 = dma.hbm_to_vmem [thread:$0]  (!%p5300_p1), %s4602_s1, 1024, %s4604_s28, %s5305_s26, %s5278_s14, %s5278_s14, %s5277_s10  }
 0x163   : > { %s582_s29 = scalar_lea.vmem [#allocation17], %s2895_s13  ;;  %s579_s16 = scalar_lea.sflag [#allocation18], %s4318_s30 }
 0x164   : > { %s589_s7 = sshll.u32 %s582_s29, 4  ;;  %s590_s7 = int_to_ptr.vmem [resolvable:$true] %s589_s7 }
 0x167   : > { %s4637_s20 = scalar_lea.hbm %s5306_s4, %s2896_s12  ;;  %s3852_s1 = scalar_lea.hbm %s5306_s4, 256 }
 0x168   : > { %s3847_s24 = scalar_lea.hbm %s4637_s20, 128  ;;  %p3853_p0 = scmp.lt.u32.totalorder %s4637_s20, %s5306_s4 }
 0x169   : > { %p3848_p5 = scmp.ne.s32.totalorder %s4637_s20, %s3847_s24  ;;  %p3854_p7 = scmp.lt.u32.totalorder %s3852_s1, %s3847_s24 }
 0x16a   : > { %p3856_p4 = scmp.lt.u32.totalorder %s3847_s24, %s4637_s20 }
 0x16b   : > { %p3850_p9 = pnand %p3848_p5, %p4346_p13  ;;  %p3855_p3 = por %p3854_p7, %p3853_p0 }
 0x16d   : > { %p3851_p2 = pneg %p3850_p9  ;;  %p3857_p6 = por %p3856_p4, %p3855_p3 }
 0x16f   : > { %p3858_p8 = pnand %p3857_p6, %p3851_p2 }
 0x171   : > { %3861 = shalt.err (!%p3858_p8)
}
 0x172   : > { %s3862_s30 = scalar_lea.vmem %s590_s7, 128  ;;  %s4074_s15 = smov [#allocation17]  }
 0x173   : > { %p3863_p11 = scmp.ne.s32.totalorder %s590_s7, %s3862_s30  ;;  %s3867_s13 = sshll.u32 %s4074_s15, 4  ;;  %s3868_s13 = int_to_ptr.vmem [resolvable:$false] %s3867_s13 }
 0x174   : > { %s3869_s11 = scalar_lea.vmem %s3868_s13, 256  ;;  %p3870_p5 = scmp.lt.s32.totalorder %s590_s7, %s3868_s13 }
 0x175   : > { %p3865_p10 = pnand %p3863_p11, %p4346_p13  ;;  %p3871_p9 = scmp.lt.s32.totalorder %s3869_s11, %s3862_s30 }
 0x177   : > { %p3866_p12 = pneg %p3865_p10  ;;  %p3872_p1 = por %p3871_p9, %p3870_p5 }
 0x179   : > { %p3873_p0 = pnand %p3872_p1, %p3866_p12 }
 0x17b   : > { %3876 = shalt.err (!%p3873_p0)
}
 0x17c   : > { %p5307_p7 = scmp.ne.s32.totalorder %s5274_s18, 0  ;;  %s5308_s23 = sld [smem:[#allocation47_spill]] }
 0x17e   : > { %3355 = dma.hbm_to_vmem [thread:$0]  (!%p5307_p7), %s4637_s20, 128, %s590_s7, %s579_s16  }
 0x182   : > { %p5309_p2 = scmp.ne.s32.totalorder %s5308_s23, 0 }
 0x183   : > { %s5310_s0 = sld [smem:[#allocation44_spill]] (!%p5309_p2)  ;;  %s4662_s6 = sand.u32 (!%p5309_p2), 1, %s4033_s21  }
 0x184   : > { %598 = sbr.rel (%p5309_p2) target bundleno = 4327 (0x10e7), region = 64  ;;  %s2910_s22 = sshll.u32 (!%p5309_p2), %s4662_s6, 4 }
 0x185   : > { %s601_s26 = scalar_lea.sflag (!%p5309_p2), [#allocation6], %s4662_s6  ;;  %s4668_s19 = scalar_lea.vmem (!%p5309_p2), [#allocation5], %s2910_s22 }
 0x189   : > { %p5311_p13 = scmp.ne.s32.totalorder (!%p5309_p2), %s5310_s0, 0 }
 0x18b   : > { %3980 = dma.done.wait (%p5311_p13), %s601_s26, 256  }
 0x18c   : > { %3982 = vsyncadd (%p5311_p13), %s601_s26, 4294967040  ;;  %s5312_s18 = sld [smem:[#allocation43_spill]]  ;;  %s5313_s9 = sld [smem:[#allocation36_spill]] }
 0x18d   : > { %s5314_s20 = sld [smem:[#allocation45_spill]] }
 0x192   : > { %s609_s29 = sand.u32 1, %s5312_s18   ;;  %s4676_s7 = sand.u32 1, %s5313_s9  }
 0x193   : > { %s3288_s16 = smul.u32 96, %s4676_s7  ;;  %s610_s24 = scalar_lea.sflag [#allocation9], %s609_s29 }
 0x194   : > { %p5315_p1 = scmp.ne.s32.totalorder %s5314_s20, 0 }
 0x195   : > { %s4679_s10 = scalar_lea.vmem [#allocation8], %s3288_s16 }
 0x196   : > { %3984 = dma.done.wait (%p5315_p1), %s610_s24, 1664  }
 0x197   : > { %3986 = vsyncadd (%p5315_p1), %s610_s24, 4294965632  ;;  %s2911_s14 = sshll.u32 %s4676_s7, 3  ;;  %s2912_s1 = sshll.u32 %s4676_s7, 4 }
 0x198   : > { %s4687_s12 = scalar_lea.vmem [#allocation10], %s2911_s14  ;;  %s628_s28 = scalar_lea.sflag [#allocation12], %s609_s29 }
 0x199   : > { %s4689_s30 = scalar_lea.vmem [#allocation11], %s2912_s1 }
 0x19a   : > { %3988 = dma.done.wait (%p5315_p1), %s628_s28, 512  }
 0x19b   : > { %3990 = vsyncadd (%p5315_p1), %s628_s28, 4294966784  ;;  %s4695_s15 = scalar_lea.vmem [#allocation13], %s2912_s1  ;;  %s646_s13 = scalar_lea.sflag [#allocation15], %s609_s29 }
 0x19c   : > { %s648_s11 = scalar_lea.vmem [#allocation14], %s4676_s7 }
 0x19d   : > { %3992 = dma.done.wait (%p5315_p1), %s646_s13, 1040  }
 0x19e   : > { %3994 = vsyncadd (%p5315_p1), %s646_s13, 4294966256  ;;  %s2914_s23 = sshll.u32 %s4676_s7, 6  ;;  %s663_s26 = scalar_lea.sflag [#allocation18], %s609_s29 }
 0x19f   : > { %s4703_s0 = scalar_lea.vmem [#allocation16], %s2914_s23  ;;  %s4705_s9 = scalar_lea.vmem [#allocation17], %s2911_s14 }
 0x1a0   : > { %3996 = dma.done.wait (%p5315_p1), %s663_s26, 128  }
 0x1a1   : > { %3998 = vsyncadd (%p5315_p1), %s663_s26, 4294967168  ;;  %p5316_p3 = scmp.eq.s32.totalorder %s5312_s18, 0 }
 0x1a3   : > { %4000 = dma.done.wait (%p5316_p3), [#allocation18], 32   ;;  %p5317_p4 = pmov %p5316_p3 }
 0x1a4   : > { %p5318_p6 = pmov %p5316_p3 }
 0x1a5   : > { %4002 = vsyncadd (%p5317_p4), [#allocation18], 4294967264 }
 0x1a6   : > { %4004 = dma.done.wait (%p5318_p6), [#allocation21], 384   ;;  %p5319_p8 = pmov %p5316_p3 }
 0x1a7   : > { %s2920_s29 = sshll.u32 %s4662_s6, 1  ;;  %s4722_s16 = scalar_lea.vmem [#allocation23], %s2910_s22 }
 0x1a8   : > { %4006 = vsyncadd (%p5319_p8), [#allocation21], 4294966912  ;;  %s4724_s20 = scalar_lea.vmem [#allocation24], %s2920_s29  ;;  %s5320_s24 = sld [smem:[#allocation40_spill]] }
 0x1ae   : > { %p2921_p11 = scmp.ne.s32.totalorder %s5320_s24, 0 }
 0x1af   : > { %v766_v0 = vld [vmem:[%s4668_s19] sm:$0xff] (!%p2921_p11)  ;;  %vm768_vm0 = vcmask (!%p2921_p11), 261120   ;;  %v767_v1 = vld [vmem:[%s4668_s19 + $0x8] sm:$0xff] (!%p2921_p11) }
 0x1b0   : > { %765 = sbr.rel (%p2921_p11) target bundleno = 439 (0x1b7), region = 112  ;;  %769 = vst.msk [vmem:[#allocation2] sm:$0xff] (!%p2921_p11), %vm768_vm0, %v766_v0  ;;  %770 = vst.msk [vmem:[#allocation2 + $0x8] sm:$0xff] (!%p2921_p11), %vm768_vm0, %v767_v1 }
 0x1b7 PF: > { %v4729_v2 = vld [vmem:[#allocation2] sm:$0xff]  ;;  %vm774_vm1 = vcmask 261120   ;;  %v4731_v3 = vld [vmem:[#allocation2 + $0x8] sm:$0xff]  ;;  %v4742_v16 = vld [vmem:[%s4679_s10] sm:$0xff]   ;;  %v4075_v18 = vmov 0.0   ;;  %vm4076_vm2 = vmmov 0   ;;  %v802_v24 = vlaneseq }
 0x1b8   : > { %v775_v4 = vsel %vm774_vm1, %v4729_v2, 0.0  ;;  %v778_v5 = vsel %vm774_vm1, %v4731_v3, 0.0  ;;  %v4745_v17 = vld [vmem:[%s4679_s10 + $0x30] sm:$0xff]   ;;  %3074 = vmatprep.subr.bf16.mxu0 %v4075_v18  ;;  %3098 = vmatprep.subr.bf16.mxu1 %v4075_v18  ;;  %v4754_v19 = vld [vmem:[%s4679_s10 + $0x8] sm:$0xff]   ;;  %v4757_v20 = vld [vmem:[%s4679_s10 + $0x38] sm:$0xff]   ;;  %vm1242_vm3 = vcmask 130048  }
 0x1b9   : > { %776 = vadd.xlane.f32.xlu0 %v775_v4  ;;  %3075 = vmatpush3.bf16.msra.mxu0 %v4742_v16  ;;  %v4767_v28 = vshrl.u32 %v802_v24, 7  ;;  %v4773_v30 = vld [vmem:[%s4705_s9] sm:$0xff]  ;;  %v4818_v48 = vld [vmem:[%s4679_s10 + $0x28] sm:$0xff]   ;;  %v4077_v51 = vmov 1966171168   ;;  %vm1369_vm4 = vcmask 1043456  }
 0x1ba   : > { %3099 = vmatpush3.bf16.msra.mxu1 %v4745_v17  ;;  %3076 = vmatprep.subr.bf16.mxu0 %v4075_v18  ;;  %v4780_v42 = vld [vmem:[%s4679_s10 + $0x10] sm:$0xff]   ;;  %v4794_v45 = vld [vmem:[%s4679_s10 + $0x18] sm:$0xff]   ;;  %v4808_v47 = vld [vmem:[%s4679_s10 + $0x20] sm:$0xff]   ;;  %v843_v52 = vunpack.c.l.s4 %v4077_v51  ;;  %vm1339_vm5 = vcmask 64512   ;;  %s5321_s22 = sld [smem:[#allocation40_spill]] }
 0x1bb   : > { %3100 = vmatprep.subr.bf16.mxu1 %v4075_v18  ;;  %3078 = vmatprep.mubr.msk.bf16.mxu0 %vm4076_vm2, %v4075_v18  ;;  %v4770_v29 = vsub.s32 0, %v4767_v28  ;;  %v810_v33 = vsub.s32 1, %v4767_v28  ;;  %v4783_v43 = vld [vmem:[%s4679_s10 + $0x50] sm:$0xff]   ;;  %v4797_v46 = vld [vmem:[%s4679_s10 + $0x58] sm:$0xff]   ;;  %v4827_v49 = vld [vmem:[%s4679_s10 + $0x40] sm:$0xff]  }
 0x1bc   : > { %3102 = vmatprep.mubr.msk.bf16.mxu1 %vm4076_vm2, %v4075_v18  ;;  %v4834_v50 = vld [vmem:[%s4679_s10 + $0x48] sm:$0xff]   ;;  %v844_v53 = vunpack.c.0.s8 %v843_v52 }
 0x1bd   : > { %779 = vadd.xlane.f32.xlu0 %v778_v5  ;;  %3077 = vmatpush3.bf16.msra.mxu0 %v4754_v19  ;;  %v805_v32 = vrot.slane %v4773_v30, %v4770_v29  ;;  %v811_v36 = vrot.slane %v4773_v30, %v810_v33  ;;  %v839_v55 = vld [vmem:[%s4687_s12] sm:$0x3f] }
 0x1be   : > { %3101 = vmatpush3.bf16.msra.mxu1 %v4757_v20  ;;  %3082 = vmatprep.subr.bf16.mxu0 %v4075_v18  ;;  %v847_v54 = vsub.s32 %v844_v53, %v4767_v28  ;;  %v841_v58 = vcombine.high %v839_v55, %v839_v55 }
 0x1bf   : > { %3114 = vmatprep.subr.bf16.mxu1 %v4075_v18 }
 0x1c0   : > { %v848_v56 = vrot.slane %v839_v55, %v847_v54  ;;  %v855_v61 = vrot.slane %v841_v58, %v847_v54  ;;  %p2974_p10 = scmp.ne.s32.totalorder %s5321_s22, 1 }
 0x1c1   : > { %s5322_s19 = sld [smem:[#allocation41_spill]] (!%p2974_p10)  ;;  %vm2414_vm6 = vcmask (!%p2974_p10), 253952   ;;  %vm4079_vm7 = vmmov (!%p2974_p10), 0  }
 0x1c2   : > { %v856_v57 = vcombine.high %v848_v56, %v848_v56  ;;  %v857_v63 = vcombine.high %v855_v61, %v855_v61  ;;  %v871_v52 = vrot.slane %v855_v61, %v847_v54 }
 0x1c4   : > { %v878_v59 = vrot.slane %v856_v57, %v847_v54 }
 0x1c6   : > { %v887_v60 = vcombine.high %v878_v59, %v878_v59 }
 0x1c7   : > { %s2975_s18 = sshll.u32 (!%p2974_p10), %s5322_s19, 1 }
 0x1c8   : > { %v4848_v62 = vrot.slane %v887_v60, %v4770_v29  ;;  %s2411_s7 = sld [smem:[#allocation4 + %s2975_s18]] (!%p2974_p10)  ;;  %s2487_s10 = sadd.s32 (!%p2974_p10), 1, %s2975_s18 }
 0x1c9   : > { %s2488_s14 = sld [smem:[#allocation4 + %s2487_s10]] (!%p2974_p10) }
 0x1ce   : > { %s2412_s1 = scalar_lea.vmem (!%p2974_p10), [#allocation2], %s2411_s7 }
 0x1cf   : > { %s2732_s12 = scalar_lea.vmem (!%p2974_p10), [#allocation2], %s2488_s14 }
 0x246   : > { %v777_v6 = vpop.xlane.xlu0 %776 }
 0x247   : > { %v782_v7 = vmul.f32 0.03125, %v777_v6 }
 0x249   : > { %v784_v8 = vsub.f32 %v4729_v2, %v782_v7  ;;  %v885_v7 = vrot.slane %v857_v63, %v847_v54 }
 0x24a   : > { %v780_v9 = vpop.xlane.xlu0 %779 }
 0x24b   : > { %v783_v10 = vmul.f32 0.03125, %v780_v9  ;;  %v786_v11 = vmul.f32 %v784_v8, %v784_v8 }
 0x24d   : > { %v785_v12 = vsub.f32 %v4731_v3, %v783_v10  ;;  %v788_v13 = vsel %vm774_vm1, %v786_v11, 0.0 }
 0x24e   : > { %789 = vadd.xlane.f32.xlu1 %v788_v13 }
 0x24f   : > { %v787_v14 = vmul.f32 %v785_v12, %v785_v12 }
 0x251   : > { %v791_v15 = vsel %vm774_vm1, %v787_v14, 0.0  ;;  %v4853_v14 = vrot.slane %v878_v59, %v4770_v29  ;;  %v4875_v59 = vrot.slane %v871_v52, %v4770_v29 }
 0x252   : > { %792 = vadd.xlane.f32.xlu1 %v791_v15  ;;  %v4856_v15 = vrot.slane %v885_v7, %v4770_v29 }
 0x2db   : > { %v790_v21 = vpop.xlane.xlu1 %789 }
 0x2dc   : > { %v794_v22 = vmul.f32 0.03125, %v790_v21  ;;  %v864_v21 = vrot.slane %v848_v56, %v847_v54 }
 0x2de   : > { %v796_v23 = vadd.f32 1e-05, %v794_v22  ;;  %v4871_v55 = vrot.slane %v864_v21, %v4770_v29 }
 0x2df   : > { %v793_v25 = vpop.xlane.xlu1 %792 }
 0x2e0   : > { %3501 = vrsqrt.f32 %v796_v23  ;;  %v795_v26 = vmul.f32 0.03125, %v793_v25 }
 0x2e2   : > { %v797_v27 = vadd.f32 1e-05, %v795_v26 }
 0x2e4   : > { %3503 = vrsqrt.f32 %v797_v27 }
 0x2ea   : > { %v3502_v31 = vpop.eup %3501 }
 0x2eb   : > { %v800_v34 = vmul.f32 %v3502_v31, %v784_v8  ;;  %v886_v31 = vcombine.high %v864_v21, %v864_v21 }
 0x2ed   : > { %v806_v37 = vmul.f32 %v805_v32, %v800_v34 }
 0x2ee   : > { %v3504_v35 = vpop.eup %3503 }
 0x2ef   : > { %v801_v38 = vmul.f32 %v3504_v35, %v785_v12  ;;  %v812_v40 = vadd.f32 %v811_v36, %v806_v37 }
 0x2f1   : > { %v807_v39 = vmul.f32 %v805_v32, %v801_v38 }
 0x2f3   : > { %v813_v41 = vadd.f32 %v811_v36, %v807_v39  ;;  %v4864_v39 = vrot.slane %v886_v31, %v4770_v29 }
 0x2f5   : > { %v4785_v44 = vpack.c.bf16 %v813_v41, %v812_v40 }
 0x2f7   : > { %3079 = vmatmul.mubr.msk.bf16.vlgmr.msra.gmra.mrb[0].mxu0 %vm774_vm1, %v4785_v44  ;;  %3103 = vmatmul.mubr.msk.bf16.vlgmr.msra.gmra.mrb[0].mxu1 %vm774_vm1, %v4785_v44 }
 0x2f8   : > { %3083 = vmatpush3.bf16.msra.mxu0 %v4780_v42  ;;  %3115 = vmatpush3.bf16.msra.mxu1 %v4783_v43 }
 0x2f9   : > { %3084 = vmatprep.subr.bf16.mxu0 %v4075_v18  ;;  %3116 = vmatprep.subr.bf16.mxu1 %v4075_v18 }
 0x2fa   : > { %3086 = vmatprep.mubr.msk.bf16.mxu0 %vm4076_vm2, %v4075_v18  ;;  %3118 = vmatprep.mubr.msk.bf16.mxu1 %vm4076_vm2, %v4075_v18 }
 0x2fc   : > { %3085 = vmatpush3.bf16.msra.mxu0 %v4794_v45  ;;  %3117 = vmatpush3.bf16.msra.mxu1 %v4797_v46 }
 0x2fd   : > { %3090 = vmatprep.subr.bf16.mxu0 %v4075_v18  ;;  %3128 = vmatprep.subr.bf16.mxu1 %v4075_v18 }
 0x2ff   : > { %3087 = vmatmul.mubr.msk.bf16.vlgmr.msra.gmra.mrb[4].mxu0 %vm774_vm1, %v4785_v44  ;;  %3119 = vmatmul.mubr.msk.bf16.vlgmr.msra.gmra.mrb[4].mxu1 %vm774_vm1, %v4785_v44 }
 0x300   : > { %3091 = vmatpush3.bf16.msra.mxu0 %v4808_v47  ;;  %3094 = vmatprep.mubr.msk.bf16.mxu0 %vm4076_vm2, %v4075_v18 }
 0x301   : > { %3092 = vmatprep.subr.bf16.mxu0 %v4075_v18  ;;  %3130 = vmatprep.mubr.msk.bf16.mxu1 %vm4076_vm2, %v4075_v18 }
 0x304   : > { %3093 = vmatpush3.bf16.msra.mxu0 %v4818_v48 }
 0x305   : > { %3106 = vmatprep.subr.bf16.mxu0 %v4075_v18 }
 0x307   : > { %3095 = vmatmul.mubr.msk.bf16.vlgmr.msra.gmra.mrb[8].mxu0 %vm774_vm1, %v4785_v44 }
 0x308   : > { %3107 = vmatpush3.bf16.msra.mxu0 %v4827_v49  ;;  %3110 = vmatprep.mubr.msk.bf16.mxu0 %vm4076_vm2, %v4075_v18 }
 0x309   : > { %3108 = vmatprep.subr.bf16.mxu0 %v4075_v18 }
 0x30c   : > { %3109 = vmatpush3.bf16.msra.mxu0 %v4834_v50 }
 0x30d   : > { %3122 = vmatprep.subr.bf16.mxu0 %v4075_v18 }
 0x30f   : > { %3111 = vmatmul.mubr.msk.bf16.vlgmr.msra.gmra.mrb[12].mxu0 %vm774_vm1, %v4785_v44 }
 0x310   : > { %3124 = vmatprep.mubr.msk.bf16.mxu0 %vm4076_vm2, %v4075_v18 }
 0x3ca   : > { %v972_v0 = vpop.f32.mrb[0].mxu0  ;;  %v1128_v1 = vpop.f32.mrb[0].mxu1 }
 0x3cb   : > { %v1129_v4 = vadd.f32 %v1128_v1, %v4848_v62  ;;  %v3080_v5 = vpop.f32.mrb[1].mxu0  ;;  %v3104_v6 = vpop.f32.mrb[1].mxu1  ;;  %v973_v60 = vadd.f32 %v972_v0, %v4871_v55 }
 0x3cc   : > { %v975_v8 = vpop.f32.mrb[2].mxu0  ;;  %v1131_v9 = vpop.f32.mrb[2].mxu1 }
 0x3cd   : > { %v1241_v10 = vpack.c.bf16 %v1129_v4, %v1129_v4  ;;  %v3081_v11 = vpop.f32.mrb[3].mxu0  ;;  %v3105_v12 = vpop.f32.mrb[3].mxu1  ;;  %v1238_v4 = vpack.c.bf16 %v973_v60, %v973_v60  ;;  %v4885_v8 = vld [vmem:[#allocation22] sm:$0xff] }
 0x3cf   : > { %v1293_v13 = vsel %vm1242_vm3, %v1241_v10, 0 }
 0x3d0   : > { %3129 = vmatpush3.bf16.xpose.msra.mxu1 %v1293_v13 }
 0x3d1   : > { %3140 = vmatprep.subr.bf16.mxu1 %v4075_v18 }
 0x3d2   : > { %v1024_v22 = vpop.f32.mrb[4].mxu0  ;;  %v1232_v23 = vpop.f32.mrb[4].mxu1 }
 0x3d3   : > { %v1025_v24 = vadd.f32 %v1024_v22, %v4853_v14  ;;  %v1233_v25 = vadd.f32 %v1232_v23, %v4856_v15  ;;  %v3088_v26 = vpop.f32.mrb[5].mxu0  ;;  %v3120_v27 = vpop.f32.mrb[5].mxu1 }
 0x3d4   : > { %v1027_v32 = vpop.f32.mrb[6].mxu0  ;;  %v1235_v33 = vpop.f32.mrb[6].mxu1 }
 0x3d5   : > { %v1239_v34 = vpack.c.bf16 %v1025_v24, %v1025_v24  ;;  %v1365_v35 = vpack.c.bf16 %v1233_v25, %v1233_v25  ;;  %v3089_v36 = vpop.f32.mrb[7].mxu0  ;;  %v3121_v37 = vpop.f32.mrb[7].mxu1 }
 0x3d7   : > { %v1417_v38 = vsel %vm1369_vm4, %v1365_v35, 0  ;;  %3131 = vmatmul.mubr.msk.bf16.vlgmr.msra.gmra.mrb[8].mxu1 %vm1242_vm3, %v1239_v34 }
 0x3d8   : > { %3141 = vmatpush3.bf16.msra.mxu1 %v1417_v38  ;;  %3142 = vmatprep.mubr.msk.bf16.mxu1 %vm4076_vm2, %v4075_v18 }
 0x3d9   : > { %3152 = vmatprep.subr.bf16.mxu1 %v4075_v18 }
 0x3da   : > { %v1076_v40 = vpop.f32.mrb[8].mxu0 }
 0x3db   : > { %v1077_v41 = vadd.f32 %v1076_v40, %v4864_v39  ;;  %v3096_v51 = vpop.f32.mrb[9].mxu0 }
 0x3dc   : > { %v1079_v53 = vpop.f32.mrb[10].mxu0 }
 0x3dd   : > { %v1240_v56 = vpack.c.bf16 %v1077_v41, %v1077_v41  ;;  %v3097_v57 = vpop.f32.mrb[11].mxu0 }
 0x3df   : > { %v1247_v58 = vsel %vm1242_vm3, %v1240_v56, 0 }
 0x3e0   : > { %3123 = vmatpush3.bf16.xpose.msra.mxu0 %v1247_v58 }
 0x3e1   : > { %3134 = vmatprep.subr.bf16.mxu0 %v4075_v18 }
 0x3e2   : > { %v1180_v63 = vpop.f32.mrb[12].mxu0 }
 0x3e3   : > { %v1181_v1 = vadd.f32 %v1180_v63, %v4875_v59  ;;  %v3112_v54 = vpop.f32.mrb[13].mxu0 }
 0x3e4   : > { %v1183_v61 = vpop.f32.mrb[14].mxu0  ;;  %v4900_v54 = vld [vmem:[%s4689_s30 + $0x8] sm:$0xff]  }
 0x3e5   : > { %v1364_v5 = vpack.c.bf16 %v1181_v1, %v1181_v1  ;;  %v3113_v6 = vpop.f32.mrb[15].mxu0  ;;  %v4905_v61 = vld [vmem:[%s4689_s30] sm:$0xff]  }
 0x3e7   : > { %v1371_v7 = vsel %vm1369_vm4, %v1364_v5, 0  ;;  %3125 = vmatmul.mubr.msk.bf16.vlgmr.msra.gmra.mrb[16].mxu0 %vm1242_vm3, %v1238_v4 }
 0x3e8   : > { %3135 = vmatpush3.bf16.msra.mxu0 %v1371_v7  ;;  %3136 = vmatprep.mubr.msk.bf16.mxu0 %vm4076_vm2, %v4075_v18 }
 0x3e9   : > { %3146 = vmatprep.subr.bf16.mxu0 %v4075_v18 }
 0x4aa   : > { %v1329_v0 = vpop.f32.mrb[8].mxu1 }
 0x4ab   : > { %v1336_v9 = vmul.f32 0.25, %v1329_v0  ;;  %v3132_v10 = vpop.f32.mrb[9].mxu1 }
 0x4ac   : > { %v1332_v11 = vpop.f32.mrb[10].mxu1 }
 0x4ad   : > { %v3133_v12 = vpop.f32.mrb[11].mxu1  ;;  %v1338_v13 = vadd.f32 %v1336_v9, %v4885_v8  ;;  %v1563_v9 = vrot.slane %v4785_v44, 4 }
 0x4af   : > { %v1343_v21 = vsel %vm1339_vm5, %v1338_v13, -inf }
 0x4b0   : > { %1344 = vmax.xlane.f32.xlu1 %v1343_v21 }
 0x4ba   : > { %v1283_v22 = vpop.f32.mrb[16].mxu0 }
 0x4bb   : > { %v1335_v23 = vmul.f32 0.25, %v1283_v22  ;;  %v3126_v24 = vpop.f32.mrb[17].mxu0 }
 0x4bc   : > { %v1286_v25 = vpop.f32.mrb[18].mxu0 }
 0x4bd   : > { %v3127_v26 = vpop.f32.mrb[19].mxu0  ;;  %v1337_v27 = vadd.f32 %v1335_v23, %v4885_v8 }
 0x4bf   : > { %v1340_v31 = vsel %vm1339_vm5, %v1337_v27, -inf }
 0x4c0   : > { %1341 = vmax.xlane.f32.xlu0 %v1340_v31 }
 0x53d   : > { %v1345_v32 = vpop.xlane.xlu1 %1344 }
 0x53e   : > { %v1347_v33 = vsub.f32 %v1338_v13, %v1345_v32 }
 0x540   : > { %v1350_v34 = vmul.f32 1.442695, %v1347_v33 }
 0x542   : > { %3505 = vpow2.f32 %v1350_v34 }
 0x54c   : > { %v3506_v35 = vpop.eup %3505 }
 0x54d   : > { %v1342_v36 = vpop.xlane.xlu0 %1341  ;;  %v1355_v37 = vsel %vm1339_vm5, %v3506_v35, 0.0 }
 0x54e   : > { %v1346_v38 = vsub.f32 %v1337_v27, %v1342_v36  ;;  %1356 = vadd.xlane.f32.xlu1 %v1355_v37 }
 0x550   : > { %v1348_v40 = vmul.f32 1.442695, %v1346_v38 }
 0x552   : > { %3507 = vpow2.f32 %v1348_v40 }
 0x55c   : > { %v3508_v41 = vpop.eup %3507 }
 0x55d   : > { %v1352_v51 = vsel %vm1339_vm5, %v3508_v41, 0.0 }
 0x55e   : > { %1353 = vadd.xlane.f32.xlu0 %v1352_v51 }
 0x5db   : > { %v1357_v52 = vpop.xlane.xlu1 %1356 }
 0x5dc   : > { %3509 = vrcp.f32 %v1357_v52 }
 0x5e6   : > { %v3510_v53 = vpop.eup %3509 }
 0x5e7   : > { %v1361_v56 = vmul.f32 %v3510_v53, %v3506_v35 }
 0x5e9   : > { %v1363_v57 = vpack.c.bf16 %v1361_v56, %v1361_v56 }
 0x5eb   : > { %3143 = vmatmul.mubr.msk.bf16.vlgmr.msra.gmra.mrb[12].mxu1 %vm1339_vm5, %v1363_v57  ;;  %v1354_v58 = vpop.xlane.xlu0 %1353 }
 0x5ec   : > { %3511 = vrcp.f32 %v1354_v58  ;;  %3154 = vmatprep.mubr.msk.bf16.mxu1 %vm4076_vm2, %v4075_v18  ;;  %3153 = vmatpush3.bf16.msra.mxu1 %v4900_v54 }
 0x5ed   : > { %3166 = vmatprep.subr.bf16.mxu1 %v4075_v18 }
 0x5f6   : > { %v3512_v60 = vpop.eup %3511 }
 0x5f7   : > { %v1360_v63 = vmul.f32 %v3512_v60, %v3508_v41 }
 0x5f9   : > { %v1362_v1 = vpack.c.bf16 %v1360_v63, %v1360_v63 }
 0x5fb   : > { %3137 = vmatmul.mubr.msk.bf16.vlgmr.msra.gmra.mrb[20].mxu0 %vm1339_vm5, %v1362_v1 }
 0x5fc   : > { %3148 = vmatprep.mubr.msk.bf16.mxu0 %vm4076_vm2, %v4075_v18  ;;  %3147 = vmatpush3.bf16.msra.mxu0 %v4905_v61 }
 0x5fd   : > { %3158 = vmatprep.subr.bf16.mxu0 %v4075_v18 }
 0x6be   : > { %v1453_v4 = vpop.f32.mrb[12].mxu1 }
 0x6bf   : > { %v1460_v5 = vpack.c.bf16 %v1453_v4, %v1453_v4  ;;  %v3144_v6 = vpop.f32.mrb[13].mxu1 }
 0x6c0   : > { %v1456_v7 = vpop.f32.mrb[14].mxu1 }
 0x6c1   : > { %v3145_v0 = vpop.f32.mrb[15].mxu1  ;;  %3155 = vmatmul.mubr.msk.bf16.vlgmr.msra.gmra.mrb[16].mxu1 %vm1242_vm3, %v1460_v5 }
 0x6c2   : > { %3167 = vmatpush3.bf16.msra.mxu1 %v4780_v42  ;;  %3170 = vmatprep.mubr.msk.bf16.mxu1 %vm4076_vm2, %v4075_v18 }
 0x6c3   : > { %3168 = vmatprep.subr.bf16.mxu1 %v4075_v18 }
 0x6c6   : > { %3169 = vmatpush3.bf16.msra.mxu1 %v4794_v45 }
 0x6c7   : > { %3182 = vmatprep.subr.bf16.mxu1 %v4075_v18 }
 0x6c9   : > { %3171 = vmatmul.mubr.msk.bf16.vlgmr.msra.gmra.mrb[20].mxu1 %vm774_vm1, %v1563_v9 }
 0x6ca   : > { %3183 = vmatpush3.bf16.msra.mxu1 %v4745_v17  ;;  %3186 = vmatprep.mubr.msk.bf16.mxu1 %vm4076_vm2, %v4075_v18 }
 0x6cb   : > { %3184 = vmatprep.subr.bf16.mxu1 %v4075_v18 }
 0x6ce   : > { %v1407_v42 = vpop.f32.mrb[20].mxu0  ;;  %3185 = vmatpush3.bf16.msra.mxu1 %v4757_v20 }
 0x6cf   : > { %v1459_v10 = vpack.c.bf16 %v1407_v42, %v1407_v42  ;;  %v3138_v11 = vpop.f32.mrb[21].mxu0  ;;  %3198 = vmatprep.subr.bf16.mxu1 %v4075_v18 }
 0x6d0   : > { %v1410_v45 = vpop.f32.mrb[22].mxu0 }
 0x6d1   : > { %v3139_v44 = vpop.f32.mrb[23].mxu0  ;;  %3149 = vmatmul.mubr.msk.bf16.vlgmr.msra.gmra.mrb[24].mxu0 %vm1242_vm3, %v1459_v10  ;;  %3187 = vmatmul.mubr.msk.bf16.vlgmr.msra.gmra.mrb[24].mxu1 %vm774_vm1, %v1563_v9 }
 0x6d2   : > { %3159 = vmatpush3.bf16.msra.mxu0 %v4742_v16  ;;  %3199 = vmatpush3.bf16.msra.mxu1 %v4783_v43 }
 0x6d3   : > { %3160 = vmatprep.subr.bf16.mxu0 %v4075_v18  ;;  %3200 = vmatprep.subr.bf16.mxu1 %v4075_v18 }
 0x6d4   : > { %3162 = vmatprep.mubr.msk.bf16.mxu0 %vm4076_vm2, %v4075_v18  ;;  %3202 = vmatprep.mubr.msk.bf16.mxu1 %vm4076_vm2, %v4075_v18 }
 0x6d6   : > { %3161 = vmatpush3.bf16.msra.mxu0 %v4754_v19  ;;  %3201 = vmatpush3.bf16.msra.mxu1 %v4797_v46 }
 0x6d7   : > { %3174 = vmatprep.subr.bf16.mxu0 %v4075_v18  ;;  %3212 = vmatprep.subr.bf16.mxu1 %v4075_v18 }
 0x6d9   : > { %3163 = vmatmul.mubr.msk.bf16.vlgmr.msra.gmra.mrb[28].mxu0 %vm774_vm1, %v1563_v9  ;;  %3203 = vmatmul.mubr.msk.bf16.vlgmr.msra.gmra.mrb[28].mxu1 %vm774_vm1, %v1563_v9 }
 0x6da   : > { %3175 = vmatpush3.bf16.msra.mxu0 %v4808_v47  ;;  %3178 = vmatprep.mubr.msk.bf16.mxu0 %vm4076_vm2, %v4075_v18 }
 0x6db   : > { %3176 = vmatprep.subr.bf16.mxu0 %v4075_v18  ;;  %3214 = vmatprep.mubr.msk.bf16.mxu1 %vm4076_vm2, %v4075_v18 }
 0x6de   : > { %3177 = vmatpush3.bf16.msra.mxu0 %v4818_v48 }
 0x6df   : > { %3190 = vmatprep.subr.bf16.mxu0 %v4075_v18 }
 0x6e1   : > { %3179 = vmatmul.mubr.msk.bf16.vlgmr.msra.gmra.mrb[32].mxu0 %vm774_vm1, %v1563_v9 }
 0x6e2   : > { %3191 = vmatpush3.bf16.msra.mxu0 %v4827_v49  ;;  %3194 = vmatprep.mubr.msk.bf16.mxu0 %vm4076_vm2, %v4075_v18 }
 0x6e3   : > { %3192 = vmatprep.subr.bf16.mxu0 %v4075_v18 }
 0x6e6   : > { %3193 = vmatpush3.bf16.msra.mxu0 %v4834_v50 }
 0x6e7   : > { %3206 = vmatprep.subr.bf16.mxu0 %v4075_v18 }
 0x6e9   : > { %3195 = vmatmul.mubr.msk.bf16.vlgmr.msra.gmra.mrb[36].mxu0 %vm774_vm1, %v1563_v9 }
 0x6ea   : > { %3208 = vmatprep.mubr.msk.bf16.mxu0 %vm4076_vm2, %v4075_v18 }
 0x794   : > { %v1553_v16 = vpop.f32.mrb[16].mxu1 }
 0x795   : > { %v3156_v17 = vpop.f32.mrb[17].mxu1  ;;  %v1560_v13 = vsel %vm774_vm1, %v1553_v16, 0.0 }
 0x796   : > { %v1556_v19 = vpop.f32.mrb[18].mxu1 }
 0x797   : > { %v3157_v20 = vpop.f32.mrb[19].mxu1 }
 0x79c   : > { %v1641_v43 = vpop.f32.mrb[20].mxu1 }
 0x79d   : > { %v3172_v46 = vpop.f32.mrb[21].mxu1  ;;  %v1642_v34 = vadd.f32 %v1641_v43, %v4853_v14 }
 0x79e   : > { %v1644_v47 = vpop.f32.mrb[22].mxu1 }
 0x79f   : > { %v3173_v48 = vpop.f32.mrb[23].mxu1  ;;  %v1808_v51 = vpack.c.bf16 %v1642_v34, %v1642_v34 }
 0x7a4   : > { %v1504_v49 = vpop.f32.mrb[24].mxu0  ;;  %v1721_v12 = vpop.f32.mrb[24].mxu1 }
 0x7a5   : > { %v1559_v50 = vsel %vm774_vm1, %v1504_v49, 0.0  ;;  %v1722_v21 = vadd.f32 %v1721_v12, %v4848_v62  ;;  %v3150_v22 = vpop.f32.mrb[25].mxu0  ;;  %v3188_v23 = vpop.f32.mrb[25].mxu1 }
 0x7a6   : > { %v4961_v24 = vadd.f32 %v1560_v13, %v1559_v50  ;;  %v1507_v25 = vpop.f32.mrb[26].mxu0  ;;  %v1724_v26 = vpop.f32.mrb[26].mxu1 }
 0x7a7   : > { %v1810_v27 = vpack.c.bf16 %v1722_v21, %v1722_v21  ;;  %v3151_v31 = vpop.f32.mrb[27].mxu0  ;;  %v3189_v32 = vpop.f32.mrb[27].mxu1 }
 0x7a8   : > { %v2120_v31 = vsub.s32 4, %v4767_v28 }
 0x7a9   : > { %v1861_v33 = vsel %vm1242_vm3, %v1810_v27, 0 }
 0x7aa   : > { %3213 = vmatpush3.bf16.xpose.msra.mxu1 %v1861_v33  ;;  %v2121_v32 = vrot.slane %v4773_v30, %v2120_v31 }
 0x7ab   : > { %3224 = vmatprep.subr.bf16.mxu1 %v4075_v18 }
 0x7ac   : > { %v1601_v35 = vpop.f32.mrb[28].mxu0  ;;  %v1801_v36 = vpop.f32.mrb[28].mxu1 }
 0x7ad   : > { %v1802_v62 = vadd.f32 %v1801_v36, %v4856_v15  ;;  %v3164_v37 = vpop.f32.mrb[29].mxu0  ;;  %v3204_v38 = vpop.f32.mrb[29].mxu1  ;;  %v1602_v5 = vadd.f32 %v1601_v35, %v4871_v55 }
 0x7ae   : > { %v1604_v40 = vpop.f32.mrb[30].mxu0  ;;  %v1804_v41 = vpop.f32.mrb[30].mxu1 }
 0x7af   : > { %v1932_v52 = vpack.c.bf16 %v1802_v62, %v1802_v62  ;;  %v3165_v53 = vpop.f32.mrb[31].mxu0  ;;  %v3205_v56 = vpop.f32.mrb[31].mxu1  ;;  %v1807_v42 = vpack.c.bf16 %v1602_v5, %v1602_v5 }
 0x7b1   : > { %v1983_v57 = vsel %vm1369_vm4, %v1932_v52, 0  ;;  %3215 = vmatmul.mubr.msk.bf16.vlgmr.msra.gmra.mrb[32].mxu1 %vm1242_vm3, %v1808_v51 }
 0x7b2   : > { %3225 = vmatpush3.bf16.msra.mxu1 %v1983_v57  ;;  %3226 = vmatprep.mubr.msk.bf16.mxu1 %vm4076_vm2, %v4075_v18 }
 0x7b3   : > { %3236 = vmatprep.subr.bf16.mxu1 %v4075_v18 }
 0x7b4   : > { %v1681_v14 = vpop.f32.mrb[32].mxu0 }
 0x7b5   : > { %v1682_v15 = vadd.f32 %v1681_v14, %v4864_v39  ;;  %v3180_v58 = vpop.f32.mrb[33].mxu0 }
 0x7b6   : > { %v1684_v60 = vpop.f32.mrb[34].mxu0 }
 0x7b7   : > { %v1809_v63 = vpack.c.bf16 %v1682_v15, %v1682_v15  ;;  %v3181_v1 = vpop.f32.mrb[35].mxu0 }
 0x7b9   : > { %v1815_v4 = vsel %vm1242_vm3, %v1809_v63, 0 }
 0x7ba   : > { %3207 = vmatpush3.bf16.xpose.msra.mxu0 %v1815_v4 }
 0x7bb   : > { %3218 = vmatprep.subr.bf16.mxu0 %v4075_v18 }
 0x7bc   : > { %v1761_v6 = vpop.f32.mrb[36].mxu0 }
 0x7bd   : > { %v1762_v7 = vadd.f32 %v1761_v6, %v4875_v59  ;;  %v3196_v0 = vpop.f32.mrb[37].mxu0 }
 0x7be   : > { %v1764_v9 = vpop.f32.mrb[38].mxu0 }
 0x7bf   : > { %v1931_v10 = vpack.c.bf16 %v1762_v7, %v1762_v7  ;;  %v3197_v11 = vpop.f32.mrb[39].mxu0 }
 0x7c1   : > { %v1937_v39 = vsel %vm1369_vm4, %v1931_v10, 0  ;;  %3209 = vmatmul.mubr.msk.bf16.vlgmr.msra.gmra.mrb[40].mxu0 %vm1242_vm3, %v1807_v42 }
 0x7c2   : > { %3219 = vmatpush3.bf16.msra.mxu0 %v1937_v39  ;;  %3220 = vmatprep.mubr.msk.bf16.mxu0 %vm4076_vm2, %v4075_v18 }
 0x7c3   : > { %3230 = vmatprep.subr.bf16.mxu0 %v4075_v18 }
 0x884   : > { %v1897_v55 = vpop.f32.mrb[32].mxu1 }
 0x885   : > { %v1904_v45 = vmul.f32 0.25, %v1897_v55  ;;  %v3216_v44 = vpop.f32.mrb[33].mxu1 }
 0x886   : > { %v1900_v16 = vpop.f32.mrb[34].mxu1 }
 0x887   : > { %v3217_v59 = vpop.f32.mrb[35].mxu1  ;;  %v1906_v17 = vadd.f32 %v1904_v45, %v4885_v8 }
 0x889   : > { %v1910_v19 = vsel %vm1339_vm5, %v1906_v17, -inf }
 0x88a   : > { %1911 = vmax.xlane.f32.xlu1 %v1910_v19 }
 0x894   : > { %v1851_v20 = vpop.f32.mrb[40].mxu0 }
 0x895   : > { %v1903_v43 = vmul.f32 0.25, %v1851_v20  ;;  %v3210_v46 = vpop.f32.mrb[41].mxu0 }
 0x896   : > { %v1854_v47 = vpop.f32.mrb[42].mxu0 }
 0x897   : > { %v3211_v48 = vpop.f32.mrb[43].mxu0  ;;  %v1905_v49 = vadd.f32 %v1903_v43, %v4885_v8  ;;  %v2116_v8 = vadd.f32 %v4961_v24, %v4729_v2 }
 0x899   : > { %v1907_v12 = vsel %vm1339_vm5, %v1905_v49, -inf  ;;  %v4992_v35 = vadd.f32 %v2121_v32, %v2116_v8  ;;  %v2158_v8 = vsub.s32 3, %v4767_v28 }
 0x89a   : > { %1908 = vmax.xlane.f32.xlu0 %v1907_v12  ;;  %v3492_v12 = vld [vmem:[%s4695_s15 + $0x8] sm:$0xff]  }
 0x89b   : > { %v2124_v36 = vsel %vm774_vm1, %v4992_v35, 0.0 }
 0x917   : > { %v1912_v13 = vpop.xlane.xlu1 %1911 }
 0x918   : > { %v1914_v50 = vsub.f32 %v1906_v17, %v1912_v13 }
 0x91a   : > { %v1917_v21 = vmul.f32 1.442695, %v1914_v50 }
 0x91c   : > { %3513 = vpow2.f32 %v1917_v21 }
 0x926   : > { %v3514_v22 = vpop.eup %3513 }
 0x927   : > { %v1909_v23 = vpop.xlane.xlu0 %1908  ;;  %v1922_v25 = vsel %vm1339_vm5, %v3514_v22, 0.0 }
 0x928   : > { %v1913_v26 = vsub.f32 %v1905_v49, %v1909_v23  ;;  %1923 = vadd.xlane.f32.xlu1 %v1922_v25  ;;  %v3491_v49 = vld [vmem:[%s4695_s15] sm:$0xff]   ;;  %v2152_v25 = vsub.s32 2, %v4767_v28 }
 0x92a   : > { %v1915_v27 = vmul.f32 1.442695, %v1913_v26 }
 0x92c   : > { %3515 = vpow2.f32 %v1915_v27  ;;  %v2153_v27 = vrot.slane %v4773_v30, %v2152_v25 }
 0x936   : > { %v3516_v33 = vpop.eup %3515 }
 0x937   : > { %v1919_v34 = vsel %vm1339_vm5, %v3516_v33, 0.0 }
 0x938   : > { %1920 = vadd.xlane.f32.xlu0 %v1919_v34 }
 0x93c   : > { %2125 = vadd.xlane.f32.xlu0 %v2124_v36  ;;  %v2159_v36 = vrot.slane %v4773_v30, %v2158_v8 }
 0x9b5   : > { %v1924_v62 = vpop.xlane.xlu1 %1923 }
 0x9b6   : > { %3517 = vrcp.f32 %v1924_v62 }
 0x9c0   : > { %v3518_v37 = vpop.eup %3517 }
 0x9c1   : > { %v1928_v38 = vmul.f32 %v3518_v37, %v3514_v22 }
 0x9c3   : > { %v1930_v40 = vpack.c.bf16 %v1928_v38, %v1928_v38 }
 0x9c5   : > { %3227 = vmatmul.mubr.msk.bf16.vlgmr.msra.gmra.mrb[36].mxu1 %vm1339_vm5, %v1930_v40  ;;  %v1921_v2 = vpop.xlane.xlu0 %1920 }
 0x9c6   : > { %3519 = vrcp.f32 %v1921_v2  ;;  %3237 = vmatpush3.bf16.msra.mxu1 %v4900_v54  ;;  %3238 = vmatprep.mubr.msk.bf16.mxu1 %vm4076_vm2, %v4075_v18  ;;  %v3493_v2 = vld [vmem:[%s4703_s0] sm:$0xff]  }
 0x9c7   : > { %3250 = vmatprep.subr.bf16.mxu1 %v4075_v18 }
 0x9c9   : > { %v2126_v24 = vpop.xlane.xlu0 %2125 }
 0x9ca   : > { %v2130_v41 = vmul.f32 0.03125, %v2126_v24  ;;  %v3494_v24 = vld [vmem:[%s4703_s0 + $0x8] sm:$0xff]  }
 0x9cc   : > { %v2132_v51 = vsub.f32 %v4992_v35, %v2130_v41  ;;  %v3495_v41 = vld [vmem:[%s4703_s0 + $0x10] sm:$0xff]  }
 0x9ce   : > { %v2134_v52 = vmul.f32 %v2132_v51, %v2132_v51 }
 0x9d0   : > { %v3520_v53 = vpop.eup %3519  ;;  %v2136_v56 = vsel %vm774_vm1, %v2134_v52, 0.0  ;;  %v3497_v52 = vld [vmem:[%s4703_s0 + $0x20] sm:$0xff]  }
 0x9d1   : > { %v1927_v57 = vmul.f32 %v3520_v53, %v3516_v33  ;;  %2137 = vadd.xlane.f32.xlu0 %v2136_v56  ;;  %v3498_v53 = vld [vmem:[%s4703_s0 + $0x28] sm:$0xff]   ;;  %v3499_v56 = vld [vmem:[%s4703_s0 + $0x30] sm:$0xff]  }
 0x9d3   : > { %v1929_v14 = vpack.c.bf16 %v1927_v57, %v1927_v57  ;;  %v3500_v57 = vld [vmem:[%s4703_s0 + $0x38] sm:$0xff]  }
 0x9d5   : > { %3221 = vmatmul.mubr.msk.bf16.vlgmr.msra.gmra.mrb[44].mxu0 %vm1339_vm5, %v1929_v14  ;;  %v2960_v14 = vld [vmem:[%s648_s11] ss:$0 sm:$0xff] }
 0x9d6   : > { %3231 = vmatpush3.bf16.msra.mxu0 %v4905_v61  ;;  %3232 = vmatprep.mubr.msk.bf16.mxu0 %vm4076_vm2, %v4075_v18 }
 0x9d7   : > { %3242 = vmatprep.subr.bf16.mxu0 %v4075_v18 }
 0xa98   : > { %v2019_v54 = vpop.f32.mrb[36].mxu1 }
 0xa99   : > { %v2026_v15 = vpack.c.bf16 %v2019_v54, %v2019_v54  ;;  %v3228_v58 = vpop.f32.mrb[37].mxu1 }
 0xa9a   : > { %v2022_v60 = vpop.f32.mrb[38].mxu1 }
 0xa9b   : > { %v3229_v63 = vpop.f32.mrb[39].mxu1  ;;  %3239 = vmatmul.mubr.msk.bf16.vlgmr.msra.gmra.mrb[40].mxu1 %vm1242_vm3, %v2026_v15 }
 0xa9c   : > { %3266 = vmatprep.mubr.msk.bf16.mxu1 %vm4076_vm2, %v4075_v18  ;;  %3251 = vmatpush3.bf16.msra.mxu1 %v3493_v2 }
 0xa9d   : > { %3252 = vmatprep.subr.bf16.mxu1 %v4075_v18 }
 0xaa0   : > { %3253 = vmatpush3.bf16.msra.mxu1 %v3494_v24 }
 0xaa1   : > { %3254 = vmatprep.subr.bf16.mxu1 %v4075_v18 }
 0xaa4   : > { %3255 = vmatpush3.bf16.msra.mxu1 %v3495_v41 }
 0xaa5   : > { %3256 = vmatprep.subr.bf16.mxu1 %v4075_v18 }
 0xaa8   : > { %v1973_v1 = vpop.f32.mrb[44].mxu0 }
 0xaa9   : > { %v2025_v4 = vpack.c.bf16 %v1973_v1, %v1973_v1  ;;  %v3222_v5 = vpop.f32.mrb[45].mxu0 }
 0xaaa   : > { %v1976_v6 = vpop.f32.mrb[46].mxu0 }
 0xaab   : > { %v3223_v61 = vpop.f32.mrb[47].mxu0  ;;  %3233 = vmatmul.mubr.msk.bf16.vlgmr.msra.gmra.mrb[48].mxu0 %vm1242_vm3, %v2025_v4 }
 0xaac   : > { %3246 = vmatprep.mubr.msk.bf16.mxu0 %vm4076_vm2, %v4075_v18  ;;  %3243 = vmatpush3.bf16.msra.mxu0 %v3491_v49 }
 0xaad   : > { %3244 = vmatprep.subr.bf16.mxu0 %v4075_v18 }
 0xab0   : > { %3245 = vmatpush3.bf16.msra.mxu0 %v3492_v12 }
 0xb6e   : > { %v2107_v7 = vpop.f32.mrb[40].mxu1 }
 0xb6f   : > { %v3240_v0 = vpop.f32.mrb[41].mxu1  ;;  %v2114_v11 = vsel %vm774_vm1, %v2107_v7, 0.0 }
 0xb70   : > { %v2110_v9 = vpop.f32.mrb[42].mxu1 }
 0xb71   : > { %v3241_v42 = vpop.f32.mrb[43].mxu1 }
 0xb7e   : > { %v2064_v10 = vpop.f32.mrb[48].mxu0 }
 0xb7f   : > { %v2113_v39 = vsel %vm774_vm1, %v2064_v10, 0.0  ;;  %v3234_v55 = vpop.f32.mrb[49].mxu0 }
 0xb80   : > { %v2115_v45 = vadd.f32 %v2114_v11, %v2113_v39  ;;  %v2067_v44 = vpop.f32.mrb[50].mxu0 }
 0xb81   : > { %v3235_v16 = vpop.f32.mrb[51].mxu0 }
 0xb82   : > { %v2117_v59 = vadd.f32 %v2115_v45, %v4731_v3  ;;  %v2138_v3 = vpop.xlane.xlu0 %2137  ;;  %v2265_v45 = vsub.s32 5, %v4767_v28 }
 0xb83   : > { %v2142_v13 = vmul.f32 0.03125, %v2138_v3 }
 0xb84   : > { %v5017_v17 = vadd.f32 %v2121_v32, %v2117_v59  ;;  %v2266_v44 = vrot.slane %v4773_v30, %v2265_v45 }
 0xb85   : > { %v2144_v50 = vadd.f32 1e-05, %v2142_v13 }
 0xb86   : > { %v2127_v19 = vsel %vm774_vm1, %v5017_v17, 0.0 }
 0xb87   : > { %2128 = vadd.xlane.f32.xlu1 %v2127_v19  ;;  %3521 = vrsqrt.f32 %v2144_v50 }
 0xb91   : > { %v3522_v26 = vpop.eup %3521 }
 0xb92   : > { %v2148_v31 = vmul.f32 %v3522_v26, %v2132_v51  ;;  %v3496_v51 = vld [vmem:[%s4703_s0 + $0x18] sm:$0xff]  }
 0xb93   : > { %3257 = vmatpush3.bf16.msra.mxu1 %v3496_v51 }
 0xb94   : > { %v2154_v33 = vmul.f32 %v2153_v27, %v2148_v31  ;;  %3258 = vmatprep.subr.bf16.mxu1 %v4075_v18 }
 0xb96   : > { %v2160_v37 = vadd.f32 %v2159_v36, %v2154_v33 }
 0xb97   : > { %3259 = vmatpush3.bf16.msra.mxu1 %v3497_v52 }
 0xb98   : > { %3260 = vmatprep.subr.bf16.mxu1 %v4075_v18 }
 0xb9b   : > { %3261 = vmatpush3.bf16.msra.mxu1 %v3498_v53 }
 0xb9c   : > { %3262 = vmatprep.subr.bf16.mxu1 %v4075_v18 }
 0xb9f   : > { %3263 = vmatpush3.bf16.msra.mxu1 %v3499_v56 }
 0xba0   : > { %3264 = vmatprep.subr.bf16.mxu1 %v4075_v18 }
 0xba3   : > { %3265 = vmatpush3.bf16.msra.mxu1 %v3500_v57 }
 0xc14   : > { %v2129_v20 = vpop.xlane.xlu1 %2128 }
 0xc15   : > { %v2131_v43 = vmul.f32 0.03125, %v2129_v20 }
 0xc17   : > { %v2133_v46 = vsub.f32 %v5017_v17, %v2131_v43 }
 0xc19   : > { %v2135_v47 = vmul.f32 %v2133_v46, %v2133_v46 }
 0xc1b   : > { %v2139_v48 = vsel %vm774_vm1, %v2135_v47, 0.0 }
 0xc1c   : > { %2140 = vadd.xlane.f32.xlu1 %v2139_v48 }
 0xca9   : > { %v2141_v21 = vpop.xlane.xlu1 %2140 }
 0xcaa   : > { %v2143_v22 = vmul.f32 0.03125, %v2141_v21 }
 0xcac   : > { %v2145_v23 = vadd.f32 1e-05, %v2143_v22 }
 0xcae   : > { %3523 = vrsqrt.f32 %v2145_v23 }
 0xcb8   : > { %v3524_v32 = vpop.eup %3523 }
 0xcb9   : > { %v2149_v34 = vmul.f32 %v3524_v32, %v2133_v46 }
 0xcbb   : > { %v2155_v62 = vmul.f32 %v2153_v27, %v2149_v34 }
 0xcbd   : > { %v2161_v38 = vadd.f32 %v2159_v36, %v2155_v62  ;;  %v4078_v62 = vmov (!%p2974_p10), 0.0  }
 0xcbe   : > { %3270 = vmatprep.subr.bf16.mxu0 (!%p2974_p10), %v4078_v62  ;;  %3278 = vmatprep.subr.bf16.mxu1 (!%p2974_p10), %v4078_v62 }
 0xcbf   : > { %v2162_v40 = vpack.c.bf16 %v2161_v38, %v2160_v37  ;;  %v3533_v37 = vld [vmem:[#allocation20] sm:$0xff] (!%p2974_p10)   ;;  %v3534_v38 = vld [vmem:[#allocation20 + $0x8] sm:$0xff] (!%p2974_p10)  }
 0xcc1   : > { %3247 = vmatmul.mubr.msk.bf16.vlgmr.msra.gmra.mrb[52].mxu0 %vm774_vm1, %v2162_v40 }
 0xcc2   : > { %3271 = vmatpush3.bf16.msra.mxu0 (!%p2974_p10), %v3533_v37  ;;  %3274 = vmatprep.mubr.msk.bf16.mxu0 (!%p2974_p10), %vm4079_vm7, %v4078_v62 }
 0xcc3   : > { %3272 = vmatprep.subr.bf16.mxu0 (!%p2974_p10), %v4078_v62 }
 0xcc6   : > { %3273 = vmatpush3.bf16.msra.mxu0 (!%p2974_p10), %v3534_v38 }
 0xd94   : > { %v2223_v54 = vpop.f32.mrb[52].mxu0 }
 0xd95   : > { %v2224_v15 = vadd.f32 %v2960_v14, %v2223_v54  ;;  %v3248_v58 = vpop.f32.mrb[53].mxu0 }
 0xd96   : > { %v2226_v60 = vpop.f32.mrb[54].mxu0 }
 0xd97   : > { %v2964_v63 = vmul.f32 -1.702, %v2224_v15  ;;  %v2227_v1 = vadd.f32 %v2960_v14, %v2226_v60  ;;  %v3249_v4 = vpop.f32.mrb[55].mxu0 }
 0xd99   : > { %v2234_v5 = vmul.f32 1.442695, %v2964_v63  ;;  %v2965_v6 = vmul.f32 -1.702, %v2227_v1 }
 0xd9b   : > { %3525 = vpow2.f32 %v2234_v5  ;;  %v2236_v61 = vmul.f32 1.442695, %v2965_v6  ;;  %v2365_v5 = vld [vmem:[#allocation19 + $0x1] sm:$0x1] (!%p2974_p10) }
 0xd9d   : > { %3527 = vpow2.f32 %v2236_v61 }
 0xda5   : > { %v3526_v7 = vpop.eup %3525 }
 0xda6   : > { %v2238_v0 = vadd.f32 1.0, %v3526_v7 }
 0xda7   : > { %v3528_v9 = vpop.eup %3527 }
 0xda8   : > { %3529 = vrcp.f32 %v2238_v0  ;;  %v2239_v18 = vadd.f32 1.0, %v3528_v9 }
 0xdaa   : > { %3531 = vrcp.f32 %v2239_v18 }
 0xdb2   : > { %v3530_v42 = vpop.eup %3529 }
 0xdb3   : > { %v2244_v11 = vmul.f32 %v3530_v42, %v2224_v15 }
 0xdb4   : > { %v3532_v10 = vpop.eup %3531 }
 0xdb5   : > { %v2245_v39 = vmul.f32 %v3532_v10, %v2227_v1  ;;  %v2364_v1 = vld [vmem:[#allocation19] sm:$0x1] (!%p2974_p10) }
 0xdb6   : > { %v2395_v9 = vrot.slane (!%p2974_p10), %v2364_v1, %v4770_v29 }
 0xdb7   : > { %v2246_v55 = vpack.c.bf16 %v2245_v39, %v2244_v11  ;;  %v2401_v11 = vrot.slane (!%p2974_p10), %v2365_v5, %v4770_v29 }
 0xdb9   : > { %3267 = vmatmul.mubr.bf16.vlgmr.msra.gmra.mrb[44].mxu1 %v2246_v55 }
 0xdba   : > { %3279 = vmatpush3.bf16.msra.mxu1 (!%p2974_p10), %v3533_v37  ;;  %3282 = vmatprep.mubr.msk.bf16.mxu1 (!%p2974_p10), %vm4079_vm7, %v4078_v62 }
 0xdbb   : > { %3280 = vmatprep.subr.bf16.mxu1 (!%p2974_p10), %v4078_v62 }
 0xdbe   : > { %3281 = vmatpush3.bf16.msra.mxu1 (!%p2974_p10), %v3534_v38 }
 0xe8c   : > { %v2349_v16 = vpop.f32.mrb[44].mxu1 }
 0xe8d   : > { %v2350_v59 = vadd.f32 %v2349_v16, %v2266_v44  ;;  %v3268_v19 = vpop.f32.mrb[45].mxu1  ;;  %2363 = sbr.rel (%p2974_p10) target bundleno = 4273 (0x10b1), region = 116 }
 0xe8e   : > { %v2352_v20 = vpop.f32.mrb[46].mxu1 }
 0xe8f   : > { %v2356_v43 = vadd.f32 %v2350_v59, %v4992_v35  ;;  %v2353_v46 = vadd.f32 %v2352_v20, %v2266_v44  ;;  %v3269_v47 = vpop.f32.mrb[47].mxu1 }
 0xe91   : > { %2358 = vst.msk [vmem:[#allocation2] sm:$0xff] %vm774_vm1, %v2356_v43  ;;  %v5053_v48 = vadd.f32 %v2353_v46, %v5017_v17  ;;  %v2366_v49 = vsel (!%p2974_p10), %vm774_vm1, %v2356_v43, 0.0 }
 0xe93   : > { %2359 = vst.msk [vmem:[#allocation2 + $0x8] sm:$0xff] %vm774_vm1, %v5053_v48  ;;  %v2369_v33 = vsel (!%p2974_p10), %vm774_vm1, %v5053_v48, 0.0 }
 0xe9a   : > { %v2413_v28 = vld [vmem:[%s2412_s1] sm:$0x1]  ;;  %v2979_v35 = vld [vmem:[%s2732_s12 + $0x8] sm:$0x1] }
 0xe9b   : > { %v2415_v30 = vsel %vm2414_vm6, %v2413_v28, 0.0  ;;  %v2492_v17 = vsel %vm2414_vm6, %v2979_v35, 0.0 }
 0xe9c   : > { %2416 = vadd.xlane.f32.xlu0 %v2415_v30 }
 0xea0   : > { %2493 = vadd.xlane.f32.xlu0 %v2492_v17 }
 0xea4   : > { %2367 = vadd.xlane.f32.xlu0 %v2366_v49 }
 0xf29   : > { %v2417_v12 = vpop.xlane.xlu0 %2416 }
 0xf2a   : > { %v2418_v3 = vmul.f32 0.03125, %v2417_v12 }
 0xf2c   : > { %v2419_v13 = vsub.f32 %v2413_v28, %v2418_v3 }
 0xf2d   : > { %v2494_v50 = vpop.xlane.xlu0 %2493 }
 0xf2e   : > { %v2495_v21 = vmul.f32 0.03125, %v2494_v50  ;;  %v2420_v22 = vmul.f32 %v2419_v13, %v2419_v13 }
 0xf30   : > { %v2496_v23 = vsub.f32 %v2979_v35, %v2495_v21  ;;  %v2421_v25 = vsel %vm2414_vm6, %v2420_v22, 0.0 }
 0xf31   : > { %2422 = vadd.xlane.f32.xlu1 %v2421_v25  ;;  %v2368_v26 = vpop.xlane.xlu0 %2367 }
 0xf32   : > { %v2497_v27 = vmul.f32 %v2496_v23, %v2496_v23  ;;  %v2372_v31 = vmul.f32 0.03125, %v2368_v26 }
 0xf34   : > { %v2498_v8 = vsel %vm2414_vm6, %v2497_v27, 0.0  ;;  %v2374_v32 = vsub.f32 %v2356_v43, %v2372_v31 }
 0xf35   : > { %2499 = vadd.xlane.f32.xlu1 %v2498_v8 }
 0xf36   : > { %v2376_v34 = vmul.f32 %v2374_v32, %v2374_v32 }
 0xf38   : > { %v2378_v36 = vsel %vm774_vm1, %v2376_v34, 0.0 }
 0xf39   : > { %2370 = vadd.xlane.f32.xlu1 %v2369_v33  ;;  %2379 = vadd.xlane.f32.xlu0 %v2378_v36 }
 0xfbe   : > { %v2423_v40 = vpop.xlane.xlu1 %2422 }
 0xfbf   : > { %v2424_v2 = vmul.f32 0.03125, %v2423_v40 }
 0xfc1   : > { %v2425_v24 = vadd.f32 1e-05, %v2424_v2 }
 0xfc2   : > { %v2500_v41 = vpop.xlane.xlu1 %2499 }
 0xfc3   : > { %3535 = vrsqrt.f32 %v2425_v24  ;;  %v2501_v51 = vmul.f32 0.03125, %v2500_v41 }
 0xfc5   : > { %v2502_v52 = vadd.f32 1e-05, %v2501_v51 }
 0xfc6   : > { %v2371_v53 = vpop.xlane.xlu1 %2370  ;;  %v2380_v56 = vpop.xlane.xlu0 %2379 }
 0xfc7   : > { %3537 = vrsqrt.f32 %v2502_v52  ;;  %v2373_v57 = vmul.f32 0.03125, %v2371_v53  ;;  %v2384_v14 = vmul.f32 0.03125, %v2380_v56 }
 0xfc9   : > { %v2375_v54 = vsub.f32 %v5053_v48, %v2373_v57  ;;  %v2386_v15 = vadd.f32 1e-05, %v2384_v14 }
 0xfcb   : > { %v2377_v58 = vmul.f32 %v2375_v54, %v2375_v54  ;;  %3539 = vrsqrt.f32 %v2386_v15 }
 0xfcd   : > { %v3536_v60 = vpop.eup %3535  ;;  %v2381_v63 = vsel %vm774_vm1, %v2377_v58, 0.0 }
 0xfce   : > { %2382 = vadd.xlane.f32.xlu1 %v2381_v63  ;;  %v2427_v4 = vmul.f32 %v3536_v60, %v2419_v13 }
 0xfd0   : > { %v2428_v6 = vmul.f32 %v2427_v4, %v2364_v1 }
 0xfd1   : > { %v3538_v61 = vpop.eup %3537 }
 0xfd2   : > { %v2429_v7 = vadd.f32 %v2428_v6, %v2365_v5  ;;  %v2504_v0 = vmul.f32 %v3538_v61, %v2496_v23 }
 0xfd4   : > { %v2430_v18 = vpack.c.bf16 %v2429_v7, %v2429_v7  ;;  %v2505_v42 = vmul.f32 %v2504_v0, %v2364_v1 }
 0xfd5   : > { %v3540_v10 = vpop.eup %3539 }
 0xfd6   : > { %3275 = vmatmul.mubr.msk.bf16.vlgmr.msra.gmra.mrb[0].mxu0 %vm774_vm1, %v2430_v18  ;;  %v2506_v39 = vadd.f32 %v2505_v42, %v2365_v5  ;;  %v2390_v55 = vmul.f32 %v3540_v10, %v2374_v32 }
 0xfd8   : > { %v2507_v45 = vpack.c.bf16 %v2506_v39, %v2506_v39  ;;  %v2396_v44 = vmul.f32 %v2395_v9, %v2390_v55 }
 0xfda   : > { %3283 = vmatmul.mubr.msk.bf16.vlgmr.msra.gmra.mrb[0].mxu1 %vm774_vm1, %v2507_v45  ;;  %v2402_v16 = vadd.f32 %v2401_v11, %v2396_v44 }
 0xfdc   : > { %2404 = vst.msk [vmem:[%s4722_s16] sm:$0xff] %vm774_vm1, %v2402_v16 }
0x105b   : > { %v2383_v59 = vpop.xlane.xlu1 %2382 }
0x105c   : > { %v2385_v19 = vmul.f32 0.03125, %v2383_v59 }
0x105e   : > { %v2387_v20 = vadd.f32 1e-05, %v2385_v19 }
0x1060   : > { %3541 = vrsqrt.f32 %v2387_v20 }
0x106a   : > { %v3542_v43 = vpop.eup %3541 }
0x106b   : > { %v2391_v29 = vmul.f32 %v3542_v43, %v2375_v54 }
0x106d   : > { %v2397_v46 = vmul.f32 %v2395_v9, %v2391_v29 }
0x106f   : > { %v2403_v47 = vadd.f32 %v2401_v11, %v2397_v46 }
0x1071   : > { %2405 = vst.msk [vmem:[%s4722_s16 + $0x8] sm:$0xff] %vm774_vm1, %v2403_v47 }
0x10a9   : > { %v2480_v48 = vpop.f32.mrb[0].mxu0 }
0x10aa   : > { %2486 = vst.msk [vmem:[%s4724_s20] sm:$0x1] %vm2414_vm6, %v2480_v48  ;;  %v3276_v28 = vpop.f32.mrb[1].mxu0 }
0x10ab   : > { %v2483_v30 = vpop.f32.mrb[2].mxu0 }
0x10ac   : > { %v3277_v35 = vpop.f32.mrb[3].mxu0 }
0x10ad   : > { %v2545_v17 = vpop.f32.mrb[0].mxu1 }
0x10ae   : > { %2981 = vst.msk [vmem:[%s4724_s20 + $0x1] sm:$0x1] %vm2414_vm6, %v2545_v17  ;;  %v3284_v49 = vpop.f32.mrb[1].mxu1 }
0x10af   : > { %v2548_v12 = vpop.f32.mrb[2].mxu1 }
0x10b0   : > { %v3285_v3 = vpop.f32.mrb[3].mxu1 }
0x10b1 PF: > { %s5323_s28 = sld [smem:[#allocation41_spill]]  ;;  %s5324_s11 = sld [smem:[#allocation61_spill]] }
0x10b2   : > { %s2572_s0 = sshll.u32 %s4722_s16, 4  ;;  %s2554_s26 = scalar_lea.sflag [#allocation7], %s4662_s6  ;;  %s5088_s0 = int_to_ptr.vmem [resolvable:$true] %s2572_s0 }
0x10b3   : > { %s3877_s9 = scalar_lea.vmem %s5088_s0, 256  ;;  %p5325_p5 = scmp.ne.s32.totalorder %s5292_s3, 0 }
0x10b4   : > { %p3878_p12 = scmp.ne.s32.totalorder %s5088_s0, %s3877_s9  ;;  %s4080_s29 = smov [#allocation23]  }
0x10b5   : > { %s3881_s24 = sshll.u32 %s4080_s29, 4  ;;  %s3882_s24 = int_to_ptr.vmem [resolvable:$false] %s3881_s24 }
0x10b6   : > { %p3879_p9 = pnand %p3878_p12, %p5325_p5  ;;  %s3883_s22 = scalar_lea.vmem %s3882_s24, 512 }
0x10b7   : > { %s2994_s30 = sshll.u32 %s5323_s28, 8  ;;  %p3884_p7 = scmp.lt.s32.totalorder %s5088_s0, %s3882_s24 }
0x10b8   : > { %s5085_s23 = scalar_lea.hbm %s5324_s11, %s2994_s30  ;;  %p3880_p0 = pneg %p3879_p9 }
0x10b9   : > { %p3885_p2 = scmp.lt.s32.totalorder %s3883_s22, %s3877_s9 }
0x10bb   : > { %p3886_p13 = por %p3885_p2, %p3884_p7 }
0x10bd   : > { %p3887_p1 = pnand %p3886_p13, %p3880_p0 }
0x10bf   : > { %3890 = shalt.err (!%p3887_p1)
}
0x10c0   : > { %s3891_s16 = scalar_lea.hbm %s5085_s23, 256  ;;  %s3895_s7 = scalar_lea.hbm %s5324_s11, 512 }
0x10c1   : > { %p3892_p3 = scmp.ne.s32.totalorder %s5085_s23, %s3891_s16  ;;  %p3896_p8 = scmp.lt.u32.totalorder %s5085_s23, %s5324_s11 }
0x10c2   : > { %p3897_p11 = scmp.lt.u32.totalorder %s3895_s7, %s3891_s16  ;;  %p3899_p12 = scmp.lt.u32.totalorder %s3891_s16, %s5085_s23 }
0x10c3   : > { %p3893_p4 = pnand %p3892_p3, %p5325_p5 }
0x10c4   : > { %p3898_p10 = por %p3897_p11, %p3896_p8 }
0x10c5   : > { %p3894_p6 = pneg %p3893_p4 }
0x10c6   : > { %p3900_p9 = por %p3899_p12, %p3898_p10 }
0x10c8   : > { %p3901_p0 = pnand %p3900_p9, %p3894_p6 }
0x10ca   : > { %3904 = shalt.err (!%p3901_p0)
}
0x10cb   : > { %s4081_s1 = smov 128   ;;  %s4082_s12 = smov 8  }
0x10cc   : > { %3317 = dma.vmem_to_hbm [thread:$0]  (%p5325_p5), %s5088_s0, 256, %s5085_s23, %s2554_s26, %s4081_s1, %s4081_s1, %s4082_s12  }
0x10cd   : > { %s2995_s30 = sshll.u32 %s5323_s28, 5  ;;  %s2588_s15 = sshll.u32 %s4724_s20, 4  ;;  %s5121_s15 = int_to_ptr.vmem [resolvable:$true] %s2588_s15 }
0x10ce   : > { %s5326_s29 = sld [smem:[#allocation62_spill]]  ;;  %s2559_s22 = scalar_lea.sflag [#allocation25], %s4662_s6 }
0x10cf   : > { %s3905_s16 = scalar_lea.vmem %s5121_s15, 32  ;;  %s4083_s19 = smov [#allocation24]  }
0x10d0   : > { %p3906_p7 = scmp.ne.s32.totalorder %s5121_s15, %s3905_s16  ;;  %s3909_s23 = sshll.u32 %s4083_s19, 4  ;;  %s3910_s23 = int_to_ptr.vmem [resolvable:$false] %s3909_s23 }
0x10d1   : > { %s3911_s20 = scalar_lea.vmem %s3910_s23, 64  ;;  %p3912_p1 = scmp.lt.s32.totalorder %s5121_s15, %s3910_s23 }
0x10d2   : > { %p3907_p2 = pnand %p3906_p7, %p5325_p5  ;;  %p3913_p3 = scmp.lt.s32.totalorder %s3911_s20, %s3905_s16 }
0x10d4   : > { %s5119_s24 = scalar_lea.hbm %s5326_s29, %s2995_s30  ;;  %p3908_p13 = pneg %p3907_p2 }
0x10d5   : > { %p3914_p4 = por %p3913_p3, %p3912_p1 }
0x10d7   : > { %p3915_p6 = pnand %p3914_p4, %p3908_p13 }
0x10d9   : > { %3918 = shalt.err (!%p3915_p6)
}
0x10da   : > { %s3919_s28 = scalar_lea.hbm %s5119_s24, 32  ;;  %s3923_s18 = scalar_lea.hbm %s5326_s29, 64 }
0x10db   : > { %p3920_p8 = scmp.ne.s32.totalorder %s5119_s24, %s3919_s28  ;;  %p3924_p12 = scmp.lt.u32.totalorder %s5119_s24, %s5326_s29 }
0x10dc   : > { %p3925_p9 = scmp.lt.u32.totalorder %s3923_s18, %s3919_s28  ;;  %p3927_p7 = scmp.lt.u32.totalorder %s3919_s28, %s5119_s24 }
0x10dd   : > { %p3921_p11 = pnand %p3920_p8, %p5325_p5 }
0x10de   : > { %p3926_p0 = por %p3925_p9, %p3924_p12 }
0x10df   : > { %p3922_p10 = pneg %p3921_p11 }
0x10e0   : > { %p3928_p2 = por %p3927_p7, %p3926_p0 }
0x10e2   : > { %p3929_p13 = pnand %p3928_p2, %p3922_p10 }
0x10e4   : > { %3932 = shalt.err (!%p3929_p13)
}
0x10e5   : > { %s4084_s14 = smov 16   ;;  %s4085_s1 = smov 1  }
0x10e6   : > { %3318 = dma.vmem_to_hbm [thread:$0]  (%p5325_p5), %s5121_s15, 32, %s5119_s24, %s2559_s22, %s4084_s14, %s4084_s14, %s4085_s1  }
0x10e7 PF: > { %s5327_s12 = sld [smem:[#allocation38_spill]]  ;;  %s5328_s30 = sld [smem:[#allocation46_spill]] }
0x10e8   : > { %p3370_p1 = scmp.ge.s32.totalorder %s4057_s27, 2 }
0x10ed   : > { %s2603_s13 = sand.u32 1, %s5327_s12   ;;  %p5329_p3 = scmp.ne.s32.totalorder %s5328_s30, 0 }
0x10ee   : > { %s2604_s9 = scalar_lea.sflag [#allocation7], %s2603_s13 }
0x10ef   : > { %p3357_p4 = pnand %p3370_p1, %p5329_p3 }
0x10f1   : > { %4008 = dma.done.wait (!%p3357_p4), %s2604_s9, 256  }
0x10f2   : > { %4010 = vsyncadd (!%p3357_p4), %s2604_s9, 4294967040  ;;  %s2613_s16 = scalar_lea.sflag [#allocation25], %s2603_s13 }
0x10f3   : > { %4012 = dma.done.wait (!%p3357_p4), %s2613_s16, 32  }
0x10f4   : > { %4014 = vsyncadd (!%p3357_p4), %s2613_s16, 4294967264  ;;  %s50_s27 = sadd.s32 1, %s4057_s27   ;;  %s5330_s18 = sld [smem:[#allocation36_spill]] }
0x10f5   : > { %p47_p6 = scmp.ge.s32.totalorder %s50_s27, 6   ;;  %s5331_s0 = sld [smem:[#allocation37_spill]] }
0x10f6   : > { %s5332_s3 = sld [smem:[#allocation39_spill]]  ;;  %s5333_s22 = sld [smem:[#allocation50_spill]] }
0x10f7   : > { %s5334_s24 = sld [smem:[#allocation42_spill]]  ;;  %s5335_s6 = sld [smem:[#allocation48_spill]] }
0x10f8   : > { %s5336_s26 = sld [smem:[#allocation49_spill]]  ;;  %s5337_s19 = smov %s5349_s17 }
0x10f9   : > { %s5338_s20 = smov %s4033_s21  ;;  %s5340_s23 = smov %s4049_s25 }
0x10fa   :  { %49 = sbr.rel (!%p47_p6) target bundleno = 39 (0x27), region = 234 }
0x10fc   : > { %s5339_s21 = smov %s5332_s3 }
0x10fd   : > { %s5341_s25 = smov %s5335_s6 }
0x1101   :  { %2618 = vsyncpa [#allocation6], 1 }
0x1102   :  { %2620 = vsyncpa [#allocation6 + $0x1], 1 }
0x1103   :  { %2621 = vsyncpa [#allocation9], 1 }
0x1104   :  { %2623 = vsyncpa [#allocation9 + $0x1], 1 }
0x1105   :  { %2624 = vsyncpa [#allocation12], 1 }
0x1106   :  { %2626 = vsyncpa [#allocation12 + $0x1], 1 }
0x1107   :  { %2627 = vsyncpa [#allocation15], 1 }
0x1108   :  { %2629 = vsyncpa [#allocation15 + $0x1], 1 }
0x1109   :  { %2630 = vsyncpa [#allocation18], 1 }
0x110a   :  { %2632 = vsyncpa [#allocation18 + $0x1], 1 }
0x110b   :  { %2633 = vsyncpa [#allocation21], 1 }
0x110c   :  { %2634 = vsyncpa [#allocation7], 1 }
0x110d   :  { %2636 = vsyncpa [#allocation7 + $0x1], 1 }
0x110e   :  { %2637 = vsyncpa [#allocation25], 1 }
0x110f   :  { %2639 = vsyncpa [#allocation25 + $0x1], 1 }

</bundles_post_ra>
